<compile_context>
chip_gen: v7x
topology: tpu7x:2x2x1
jax: 0.10.0
libtpu: 0.0.40
codegen_flags: <defaults>
</compile_context>

<pallas_src>
import functools

import numpy as np
import jax
import jax.numpy as jnp
from jax.experimental import pallas as pl
from jax.experimental.pallas import tpu as pltpu

_LANE = 128


# ----------------------------------------------------------------------------
# helpers: generation-aware VMEM budget and legal tile sizes
# ----------------------------------------------------------------------------
def _round_up(x, m):
    return ((x + m - 1) // m) * m


def _vmem_limit_bytes():
    try:
        cap = int(pltpu.get_tpu_info().vmem_capacity_bytes)
    except Exception:
        cap = 64 * 1024 * 1024          # v7x per-TC capacity (most restrictive)
    return int(cap * 0.7)               # leave headroom for compiler scratch


def _pick_tile(n, *, lane, cands=(1024, 512, 256, 128)):
    """Largest divisor tile; lane-dim tiles must be multiples of 128."""
    if not lane:
        cands = cands + (64, 32, 16, 8)
    for t in cands:
        if n % t == 0:
            return t
    # TODO(synk): ragged N falls back to a single full block along this axis;
    # pad N to a multiple of 128 upstream for best tiling at large scale.
    return n


# ----------------------------------------------------------------------------
# Kernel 1a: dinv = rsqrt(colsum(A) + 1 + 1e-10)      (degree of A + I)
# Grid: (col blocks [parallel], row blocks [reduction]); output (1, N) resident.
# ----------------------------------------------------------------------------
def _degree_kernel(a_ref, d_ref):
    i = pl.program_id(1)

    @pl.when(i == 0)
    def _():
        d_ref[...] = jnp.zeros_like(d_ref)

    d_ref[...] += jnp.sum(a_ref[...], axis=0, keepdims=True)

    @pl.when(i == pl.num_programs(1) - 1)
    def _():
        # D = colsum(A + I) = colsum(A) + 1 ;  store D^{-1/2}
        d_ref[...] = jax.lax.rsqrt(d_ref[...] + 1.0 + 1e-10)


def degree_invsqrt(a, *, vmem_limit):
    n = a.shape[0]
    tm = _pick_tile(n, lane=False)
    tn = _pick_tile(n, lane=True)
    return pl.pallas_call(
        _degree_kernel,
        out_shape=jax.ShapeDtypeStruct((1, n), jnp.float32),
        grid=(n // tn, n // tm),
        in_specs=[pl.BlockSpec((tm, tn), lambda j, i: (i, j))],
        out_specs=pl.BlockSpec((1, tn), lambda j, i: (0, j)),
        compiler_params=pltpu.CompilerParams(
            dimension_semantics=("parallel", "arbitrary"),
            vmem_limit_bytes=vmem_limit),
    )(a)


# ----------------------------------------------------------------------------
# Kernel 1b: M = I - (1 - alpha) * D^{-1/2} (A + I) D^{-1/2}   (tiled, parallel)
# ----------------------------------------------------------------------------
def _prep_kernel(a_ref, dr_ref, dc_ref, m_ref, *, alpha, tm, tn):
    i = pl.program_id(0)
    j = pl.program_id(1)
    a = a_ref[...]
    row = jax.lax.broadcasted_iota(jnp.int32, a.shape, 0) + i * tm
    col = jax.lax.broadcasted_iota(jnp.int32, a.shape, 1) + j * tn
    is_diag = row == col
    a_loop = jnp.where(is_diag, a + 1.0, a)            # A + I, no eye temp
    t_sym = dr_ref[...] * a_loop * dc_ref[...]         # D^-1/2 (A+I) D^-1/2
    m = (alpha - 1.0) * t_sym                          # -(1 - alpha) * T_sym
    m_ref[...] = jnp.where(is_diag, 1.0 + m, m)        # I - (1 - alpha) T_sym


def prep_inverse_operand(a, dinv_col, dinv_row, *, alpha, vmem_limit):
    n = a.shape[0]
    tm = _pick_tile(n, lane=False)
    tn = _pick_tile(n, lane=True)
    return pl.pallas_call(
        functools.partial(_prep_kernel, alpha=float(alpha), tm=tm, tn=tn),
        out_shape=jax.ShapeDtypeStruct((n, n), jnp.float32),
        grid=(n // tm, n // tn),
        in_specs=[
            pl.BlockSpec((tm, tn), lambda i, j: (i, j)),   # A tile
            pl.BlockSpec((tm, 1), lambda i, j: (i, 0)),    # left  D^-1/2 (sublane)
            pl.BlockSpec((1, tn), lambda i, j: (0, j)),    # right D^-1/2 (lane)
        ],
        out_specs=pl.BlockSpec((tm, tn), lambda i, j: (i, j)),
        compiler_params=pltpu.CompilerParams(
            dimension_semantics=("parallel", "parallel"),
            vmem_limit_bytes=vmem_limit),
    )(a, dinv_col, dinv_row)


# ----------------------------------------------------------------------------
# Kernel 2a: inv_d = 1 / (colsum(S * (S >= eps)) + 1e-10)      (f32 accumulate)
# ----------------------------------------------------------------------------
def _colsum_kernel(s_ref, d_ref, *, eps):
    i = pl.program_id(1)

    @pl.when(i == 0)
    def _():
        d_ref[...] = jnp.zeros_like(d_ref)

    s = s_ref[...].astype(jnp.float32)               # upcast bf16 before summing
    s_t = jnp.where(s >= eps, s, 0.0)                # S.multiply(S >= eps)
    d_ref[...] += jnp.sum(s_t, axis=0, keepdims=True)

    @pl.when(i == pl.num_programs(1) - 1)
    def _():
        d_ref[...] = 1.0 / (d_ref[...] + 1e-10)


def colsum_reciprocal(s, *, eps, vmem_limit):
    n = s.shape[0]
    tm = _pick_tile(n, lane=False)
    tn = _pick_tile(n, lane=True)
    return pl.pallas_call(
        functools.partial(_colsum_kernel, eps=float(eps)),
        out_shape=jax.ShapeDtypeStruct((1, n), jnp.float32),
        grid=(n // tn, n // tm),
        in_specs=[pl.BlockSpec((tm, tn), lambda j, i: (i, j))],
        out_specs=pl.BlockSpec((1, tn), lambda j, i: (0, j)),
        compiler_params=pltpu.CompilerParams(
            dimension_semantics=("parallel", "arbitrary"),
            vmem_limit_bytes=vmem_limit),
    )(s)


# ----------------------------------------------------------------------------
# Kernel 2b: fused sparsify + diffusion matmul + MLP head + log_softmax
# Grid: (row blocks [parallel], col blocks [reduction]).  The column
# normalization and (optionally) W1 are already folded into xw, so the inner
# loop is a single MXU matmul on the sparsified S tile; the (tm, Dp) f32
# accumulator lives in scratch and the MLP head runs per row block at k==last.
# ----------------------------------------------------------------------------
def _diffuse_mlp_kernel(*refs, eps, folded):
    if folded:
        s_ref, xw_ref, b1_ref, w2_ref, b2_ref, o_ref, acc_ref = refs
        w1_ref = None
    else:
        s_ref, xw_ref, w1_ref, b1_ref, w2_ref, b2_ref, o_ref, acc_ref = refs

    k = pl.program_id(1)

    @pl.when(k == 0)
    def _():
        acc_ref[...] = jnp.zeros_like(acc_ref)

    s = s_ref[...].astype(jnp.float32)               # elementwise stays f32 (v5e)
    s_t = jnp.where(s >= eps, s, 0.0)                # sparsify
    xw = xw_ref[...]                                 # column-normalized (and W1-folded) rows
    acc_ref[...] += jnp.dot(s_t.astype(xw.dtype), xw,
                            preferred_element_type=jnp.float32)

    @pl.when(k == pl.num_programs(1) - 1)
    def _():
        acc = acc_ref[...]
        # dropout(p, training=False) is the identity in eval mode.
        if folded:
            h = jnp.maximum(acc + b1_ref[...], 0.0)
        else:
            h = jnp.maximum(
                jnp.dot(acc, w1_ref[...], preferred_element_type=jnp.float32)
                + b1_ref[...], 0.0)
        logits = (jnp.dot(h, w2_ref[...], preferred_element_type=jnp.float32)
                  + b2_ref[...])
        m = jnp.max(logits, axis=1, keepdims=True)
        z = logits - m
        o_ref[...] = z - jnp.log(jnp.sum(jnp.exp(z), axis=1, keepdims=True))


def _pick_diffusion_tiles(n, dp, hp, c, s_bytes, xw_bytes, folded, fp, budget):
    tm_cands = [t for t in (1024, 512, 256, 128, 64, 32, 16, 8) if n % t == 0] or [n]
    tk_cands = [t for t in (1024, 512, 256, 128) if n % t == 0] or [n]
    w_fixed = 4 * ((0 if folded else fp * hp) + hp + hp * c + c)
    best = None
    for tm in tm_cands:
        for tk in tk_cands:
            need = (2 * w_fixed                         # resident weights / biases
                    + 4 * tm * dp                       # f32 accumulator scratch
                    + 2 * 4 * tm * max(c, _LANE)        # output block (lane-padded)
                    + 2 * s_bytes * tm * tk             # S stream, double-buffered
                    + 2 * xw_bytes * tk * dp)           # xw stream, double-buffered
            if need <= budget:
                key = (tm * tk, tk)
                if best is None or key > best[0]:
                    best = (key, tm, tk)
    if best is None:
        return tm_cands[-1], tk_cands[-1]
    return best[1], best[2]


def diffuse_mlp(s, xw, w1_pad, b1_pad, w2_pad, b2, *, eps, folded, vmem_limit):
    n = s.shape[0]
    dp = xw.shape[1]
    hp = b1_pad.shape[1]
    c = w2_pad.shape[1]
    fp = 0 if folded else w1_pad.shape[0]
    s_bytes = s.dtype.itemsize
    xw_bytes = xw.dtype.itemsize
    budget = vmem_limit - (2 << 20)
    tm, tk = _pick_diffusion_tiles(n, dp, hp, c, s_bytes, xw_bytes, folded, fp, budget)
    grid = (n // tm, n // tk)

    in_specs = [
        pl.BlockSpec((tm, tk), lambda i, k: (i, k)),     # S tile (row x col)
        pl.BlockSpec((tk, dp), lambda i, k: (k, 0)),     # matching rows of xw
    ]
    args = [s, xw]
    if not folded:
        in_specs.append(pl.BlockSpec((fp, hp), lambda i, k: (0, 0)))   # W1 resident
        args.append(w1_pad)
    in_specs += [
        pl.BlockSpec((1, hp), lambda i, k: (0, 0)),      # b1
        pl.BlockSpec((hp, c), lambda i, k: (0, 0)),      # W2
        pl.BlockSpec((1, c), lambda i, k: (0, 0)),       # b2
    ]
    args += [b1_pad, w2_pad, b2]

    kernel = functools.partial(_diffuse_mlp_kernel, eps=float(eps), folded=folded)
    flops = 2 * n * n * dp + (0 if folded else 2 * n * fp * hp) + 2 * n * hp * c

    return pl.pallas_call(
        kernel,
        out_shape=jax.ShapeDtypeStruct((n, c), jnp.float32),
        grid_spec=pltpu.PrefetchScalarGridSpec(
            num_scalar_prefetch=0,
            grid=grid,
            in_specs=in_specs,
            out_specs=pl.BlockSpec((tm, c), lambda i, k: (i, 0)),
            scratch_shapes=[pltpu.VMEM((tm, dp), jnp.float32)],
        ),
        compiler_params=pltpu.CompilerParams(
            dimension_semantics=("parallel", "arbitrary"),
            vmem_limit_bytes=vmem_limit),
        cost_estimate=pl.CostEstimate(
            flops=flops,
            transcendentals=2 * n * c,
            bytes_accessed=s_bytes * n * n + xw_bytes * n * dp + 4 * n * c),
    )(*args)


# ----------------------------------------------------------------------------
# End-to-end forward
# ----------------------------------------------------------------------------
@functools.partial(jax.jit, static_argnames=("alpha", "eps", "use_bf16"))
def gdc_model_forward(a, x, w1, b1, w2, b2, *, alpha, eps, use_bf16=True):
    n, f = x.shape
    h = w1.shape[1]
    vmem_limit = _vmem_limit_bytes()

    # ---- kernel 1a + 1b: operand of the matrix inverse ----------------------
    dinv_row = degree_invsqrt(a, vmem_limit=vmem_limit)          # (1, N)
    dinv_col = dinv_row.reshape(n, 1)                            # 4N-byte reshape
    m = prep_inverse_operand(a, dinv_col, dinv_row, alpha=alpha,
                             vmem_limit=vmem_limit)

    # TODO(synk): dense O(N^3) matrix inversion has no clean Pallas TPU
    # primitive; it stays in XLA between the Pallas kernels.
    s = alpha * jnp.linalg.inv(m)
    if use_bf16:
        s = s.astype(jnp.bfloat16)        # halve HBM traffic of the N^2 stream

    # ---- kernel 2a: reciprocal column sums of sparsified S -------------------
    inv_d = colsum_reciprocal(s, eps=eps, vmem_limit=vmem_limit)  # (1, N) f32
    inv_d_col = inv_d.reshape(n, 1)

    # ---- glue: fold column normalization (and W1 when H <= F) into the small
    # (N, F/H) operand instead of the N^2 S stream; pad the lane dim to a
    # multiple of 128.  O(N*F*H) work, negligible vs O(N^2*H), left to XLA.
    folded = h <= f
    fp = _round_up(f, _LANE)
    hp = _round_up(h, _LANE)
    x_pad = jnp.pad(x, ((0, 0), (0, fp - f)))
    w1_pad = jnp.pad(w1, ((0, fp - f), (0, hp - h)))
    b1_pad = jnp.pad(b1, ((0, 0), (0, hp - h)))
    w2_pad = jnp.pad(w2, ((0, hp - h), (0, 0)))
    xn = x_pad * inv_d_col                           # (S~/d) @ x == S~ @ (x * 1/d)
    xw = (xn @ w1_pad) if folded else xn             # fold W1: T_S @ (x @ W1)
    xw = xw.astype(s.dtype)                          # bf16 MXU operands when use_bf16

    # ---- kernel 2b: fused sparsify + diffusion + MLP head + log_softmax ------
    return diffuse_mlp(s, xw, w1_pad, b1_pad, w2_pad, b2, eps=eps,
                       folded=folded, vmem_limit=vmem_limit)


# ----------------------------------------------------------------------------
# Pure-JAX reference (mirrors the PyTorch / scipy semantics)
# ----------------------------------------------------------------------------
def reference_forward(a, x, w1, b1, w2, b2, alpha, eps):
    n = a.shape[0]
    a_loop = a + jnp.eye(n, dtype=jnp.float32)
    d = a_loop.sum(axis=0)
    dinv = 1.0 / jnp.sqrt(d + 1e-10)
    t_sym = dinv[:, None] * a_loop * dinv[None, :]
    s = alpha * jnp.linalg.inv(jnp.eye(n, dtype=jnp.float32)
                               - (1.0 - alpha) * t_sym)
    s_tilde = jnp.where(s >= eps, s, 0.0)
    t_s = s_tilde / (s_tilde.sum(axis=0)[None, :] + 1e-10)
    h = jnp.maximum(t_s @ x @ w1 + b1, 0.0)
    logits = h @ w2 + b2
    return jax.nn.log_softmax(logits, axis=1)


if __name__ == "__main__":
    def make_inputs(key, n, f, h, c):
        k_adj, k_x, k_w1, k_b1, k_w2, k_b2 = jax.random.split(key, 6)
        # synthetic undirected graph -> dense binary adjacency, no self-loops
        probs = jax.random.uniform(k_adj, (n, n))
        adj = (probs < 0.3).astype(jnp.float32)
        adj = jnp.maximum(adj, adj.T)
        adj = adj * (1.0 - jnp.eye(n, dtype=jnp.float32))
        x = jax.random.normal(k_x, (n, f), dtype=jnp.float32)
        # PyTorch-style Linear init, weights stored pre-transposed [in, out]
        k1 = 1.0 / np.sqrt(f)
        w1 = jax.random.uniform(k_w1, (f, h), minval=-k1, maxval=k1, dtype=jnp.float32)
        b1 = jax.random.uniform(k_b1, (1, h), minval=-k1, maxval=k1, dtype=jnp.float32)
        k2 = 1.0 / np.sqrt(h)
        w2 = jax.random.uniform(k_w2, (h, c), minval=-k2, maxval=k2, dtype=jnp.float32)
        b2 = jax.random.uniform(k_b2, (1, c), minval=-k2, maxval=k2, dtype=jnp.float32)
        return adj, x, w1, b1, w2, b2

    alpha, eps = 0.15, 1e-4
    k_a, k_b = jax.random.split(jax.random.PRNGKey(0))

    # Case 1: H > F (diffuse raw features, W1 applied in the epilogue), N=16.
    a1 = make_inputs(k_a, 16, 8, 32, 4)
    out1 = jax.block_until_ready(
        gdc_model_forward(*a1, alpha=alpha, eps=eps, use_bf16=False))
    ref1 = jax.block_until_ready(reference_forward(*a1, alpha, eps))
    np.testing.assert_allclose(np.asarray(out1), np.asarray(ref1),
                               rtol=5e-4, atol=5e-4)

    # Case 2: H <= F (W1 folded into the diffusion), 3x3 tiled grid, f32.
    a2 = make_inputs(k_b, 384, 256, 32, 4)
    out2 = jax.block_until_ready(
        gdc_model_forward(*a2, alpha=alpha, eps=eps, use_bf16=False))
    ref2 = jax.block_until_ready(reference_forward(*a2, alpha, eps))
    np.testing.assert_allclose(np.asarray(out2), np.asarray(ref2),
                               rtol=5e-4, atol=5e-4)

    # Case 3: bf16 S stream (default fast path on v6e/v7x), loose tolerance.
    out3 = jax.block_until_ready(
        gdc_model_forward(*a2, alpha=alpha, eps=eps, use_bf16=True))
    np.testing.assert_allclose(np.asarray(out3), np.asarray(ref2),
                               rtol=5e-2, atol=5e-2)

    print("KERNEL_OK")
</pallas_src>

<mosaic_0001>
module attributes {stable_mosaic.version = 11 : i64} {
  func.func @_degree_kernel(%arg0: i32, %arg1: i32, %arg2: memref<16x16xf32, #tpu.memory_space<vmem>>, %arg3: memref<1x16xf32, #tpu.memory_space<vmem>>) attributes {dimension_semantics = [#tpu.dimension_semantics<parallel>, #tpu.dimension_semantics<arbitrary>], iteration_bounds = array<i64: 1, 1>, scalar_prefetch = 0 : i64, scratch_operands = 0 : i64, tpu.core_type = #tpu.core_type<tc>, window_params = [{transform_indices = @transform_0, window_bounds = array<i64: 16, 16>}, {transform_indices = @transform_1, window_bounds = array<i64: 1, 16>}]} {
    %c0_i32 = arith.constant 0 : i32
    %0 = arith.cmpi eq, %arg1, %c0_i32 : i32
    %1 = arith.extui %0 : i1 to i32
    %c0_i32_0 = arith.constant 0 : i32
    %2 = arith.cmpi ne, %1, %c0_i32_0 : i32
    scf.if %2 {
      %cst_8 = arith.constant 0.000000e+00 : f32
      %12 = vector.broadcast %cst_8 : f32 to vector<1x16xf32>
      %c0_9 = arith.constant 0 : index
      %c0_10 = arith.constant 0 : index
      %13 = vector.load %arg3[%c0_9, %c0_10] : memref<1x16xf32, #tpu.memory_space<vmem>>, vector<1x16xf32>
      tpu.vector_store %arg3[%c0_9, %c0_10], %12 {strides = array<i32>} : memref<1x16xf32, #tpu.memory_space<vmem>>, vector<1x16xf32>,
    } else {
    }
    %c0 = arith.constant 0 : index
    %c0_1 = arith.constant 0 : index
    %3 = vector.load %arg3[%c0, %c0_1] : memref<1x16xf32, #tpu.memory_space<vmem>>, vector<1x16xf32>
    %c0_2 = arith.constant 0 : index
    %c0_3 = arith.constant 0 : index
    %4 = vector.load %arg2[%c0_2, %c0_3] : memref<16x16xf32, #tpu.memory_space<vmem>>, vector<16x16xf32>
    %cst = arith.constant dense<0.000000e+00> : vector<16xf32>
    %5 = vector.multi_reduction <add>, %4, %cst [0] : vector<16x16xf32> to vector<16xf32>
    %6 = vector.shape_cast %5 : vector<16xf32> to vector<1x16xf32>
    %7 = arith.addf %3, %6 : vector<1x16xf32>
    %c0_4 = arith.constant 0 : index
    %c0_5 = arith.constant 0 : index
    %8 = vector.load %arg3[%c0_4, %c0_5] : memref<1x16xf32, #tpu.memory_space<vmem>>, vector<1x16xf32>
    tpu.vector_store %arg3[%c0_4, %c0_5], %7 {strides = array<i32>} : memref<1x16xf32, #tpu.memory_space<vmem>>, vector<1x16xf32>,
    %c0_i32_6 = arith.constant 0 : i32
    %9 = arith.cmpi eq, %arg1, %c0_i32_6 : i32
    %10 = arith.extui %9 : i1 to i32
    %c0_i32_7 = arith.constant 0 : i32
    %11 = arith.cmpi ne, %10, %c0_i32_7 : i32
    scf.if %11 {
      %c0_8 = arith.constant 0 : index
      %c0_9 = arith.constant 0 : index
      %12 = vector.load %arg3[%c0_8, %c0_9] : memref<1x16xf32, #tpu.memory_space<vmem>>, vector<1x16xf32>
      %cst_10 = arith.constant 1.000000e+00 : f32
      %13 = vector.broadcast %cst_10 : f32 to vector<1x16xf32>
      %14 = arith.addf %12, %13 : vector<1x16xf32>
      %cst_11 = arith.constant 1.000000e-10 : f32
      %15 = vector.broadcast %cst_11 : f32 to vector<1x16xf32>
      %16 = arith.addf %14, %15 : vector<1x16xf32>
      %17 = math.rsqrt %16 : vector<1x16xf32>
      %c0_12 = arith.constant 0 : index
      %c0_13 = arith.constant 0 : index
      %18 = vector.load %arg3[%c0_12, %c0_13] : memref<1x16xf32, #tpu.memory_space<vmem>>, vector<1x16xf32>
      tpu.vector_store %arg3[%c0_12, %c0_13], %17 {strides = array<i32>} : memref<1x16xf32, #tpu.memory_space<vmem>>, vector<1x16xf32>,
    } else {
    }
    return
  }
  func.func @transform_0(%arg0: i32, %arg1: i32) -> (i32, i32) {
    %c0_i32 = arith.constant 0 : i32
    return %arg1, %arg0 : i32, i32
  }
  func.func @transform_1(%arg0: i32, %arg1: i32) -> (i32, i32) {
    %c0_i32 = arith.constant 0 : i32
    %c0_i32_0 = arith.constant 0 : i32
    return %c0_i32, %arg0 : i32, i32
  }
}

module attributes {stable_mosaic.version = 11 : i64} {
  func.func @_prep_kernel(%arg0: i32, %arg1: i32, %arg2: memref<16x16xf32, #tpu.memory_space<vmem>>, %arg3: memref<16x1xf32, #tpu.memory_space<vmem>>, %arg4: memref<1x16xf32, #tpu.memory_space<vmem>>, %arg5: memref<16x16xf32, #tpu.memory_space<vmem>>) attributes {dimension_semantics = [#tpu.dimension_semantics<parallel>, #tpu.dimension_semantics<parallel>], iteration_bounds = array<i64: 1, 1>, scalar_prefetch = 0 : i64, scratch_operands = 0 : i64, tpu.core_type = #tpu.core_type<tc>, window_params = [{transform_indices = @transform_0, window_bounds = array<i64: 16, 16>}, {transform_indices = @transform_1, window_bounds = array<i64: 16, 1>}, {transform_indices = @transform_2, window_bounds = array<i64: 1, 16>}, {transform_indices = @transform_3, window_bounds = array<i64: 16, 16>}]} {
    %c0 = arith.constant 0 : index
    %c0_0 = arith.constant 0 : index
    %0 = vector.load %arg2[%c0, %c0_0] : memref<16x16xf32, #tpu.memory_space<vmem>>, vector<16x16xf32>
    %1 = tpu.iota {dimensions = array<i32: 0>} : vector<16x16xi32>
    %c16_i32 = arith.constant 16 : i32
    %2 = arith.muli %arg0, %c16_i32 : i32
    %3 = vector.broadcast %2 : i32 to vector<16x16xi32>
    %4 = arith.addi %1, %3 : vector<16x16xi32>
    %5 = tpu.iota {dimensions = array<i32: 1>} : vector<16x16xi32>
    %c16_i32_1 = arith.constant 16 : i32
    %6 = arith.muli %arg1, %c16_i32_1 : i32
    %7 = vector.broadcast %6 : i32 to vector<16x16xi32>
    %8 = arith.addi %5, %7 : vector<16x16xi32>
    %9 = arith.cmpi eq, %4, %8 : vector<16x16xi32>
    %cst = arith.constant 1.000000e+00 : f32
    %10 = vector.broadcast %cst : f32 to vector<16x16xf32>
    %11 = arith.addf %0, %10 : vector<16x16xf32>
    %12 = arith.select %9, %11, %0 : vector<16x16xi1>, vector<16x16xf32>
    %c0_2 = arith.constant 0 : index
    %c0_3 = arith.constant 0 : index
    %13 = vector.load %arg3[%c0_2, %c0_3] : memref<16x1xf32, #tpu.memory_space<vmem>>, vector<16x1xf32>
    %14 = vector.broadcast %13 : vector<16x1xf32> to vector<16x16xf32>
    %15 = arith.mulf %14, %12 : vector<16x16xf32>
    %c0_4 = arith.constant 0 : index
    %c0_5 = arith.constant 0 : index
    %16 = vector.load %arg4[%c0_4, %c0_5] : memref<1x16xf32, #tpu.memory_space<vmem>>, vector<1x16xf32>
    %17 = vector.broadcast %16 : vector<1x16xf32> to vector<16x16xf32>
    %18 = arith.mulf %15, %17 : vector<16x16xf32>
    %cst_6 = arith.constant -8.500000e-01 : f32
    %19 = vector.broadcast %cst_6 : f32 to vector<16x16xf32>
    %20 = arith.mulf %19, %18 : vector<16x16xf32>
    %cst_7 = arith.constant 1.000000e+00 : f32
    %21 = vector.broadcast %cst_7 : f32 to vector<16x16xf32>
    %22 = arith.addf %21, %20 : vector<16x16xf32>
    %23 = arith.select %9, %22, %20 : vector<16x16xi1>, vector<16x16xf32>
    %c0_8 = arith.constant 0 : index
    %c0_9 = arith.constant 0 : index
    %24 = vector.load %arg5[%c0_8, %c0_9] : memref<16x16xf32, #tpu.memory_space<vmem>>, vector<16x16xf32>
    tpu.vector_store %arg5[%c0_8, %c0_9], %23 {strides = array<i32>} : memref<16x16xf32, #tpu.memory_space<vmem>>, vector<16x16xf32>,
    return
  }
  func.func @transform_0(%arg0: i32, %arg1: i32) -> (i32, i32) {
    %c0_i32 = arith.constant 0 : i32
    return %arg0, %arg1 : i32, i32
  }
  func.func @transform_1(%arg0: i32, %arg1: i32) -> (i32, i32) {
    %c0_i32 = arith.constant 0 : i32
    %c0_i32_0 = arith.constant 0 : i32
    return %arg0, %c0_i32 : i32, i32
  }
  func.func @transform_2(%arg0: i32, %arg1: i32) -> (i32, i32) {
    %c0_i32 = arith.constant 0 : i32
    %c0_i32_0 = arith.constant 0 : i32
    return %c0_i32, %arg1 : i32, i32
  }
  func.func @transform_3(%arg0: i32, %arg1: i32) -> (i32, i32) {
    %c0_i32 = arith.constant 0 : i32
    return %arg0, %arg1 : i32, i32
  }
}

module attributes {stable_mosaic.version = 11 : i64} {
  func.func @_colsum_kernel(%arg0: i32, %arg1: i32, %arg2: memref<16x16xf32, #tpu.memory_space<vmem>>, %arg3: memref<1x16xf32, #tpu.memory_space<vmem>>) attributes {dimension_semantics = [#tpu.dimension_semantics<parallel>, #tpu.dimension_semantics<arbitrary>], iteration_bounds = array<i64: 1, 1>, scalar_prefetch = 0 : i64, scratch_operands = 0 : i64, tpu.core_type = #tpu.core_type<tc>, window_params = [{transform_indices = @transform_0, window_bounds = array<i64: 16, 16>}, {transform_indices = @transform_1, window_bounds = array<i64: 1, 16>}]} {
    %c0_i32 = arith.constant 0 : i32
    %0 = arith.cmpi eq, %arg1, %c0_i32 : i32
    %1 = arith.extui %0 : i1 to i32
    %c0_i32_0 = arith.constant 0 : i32
    %2 = arith.cmpi ne, %1, %c0_i32_0 : i32
    scf.if %2 {
      %cst_10 = arith.constant 0.000000e+00 : f32
      %16 = vector.broadcast %cst_10 : f32 to vector<1x16xf32>
      %c0_11 = arith.constant 0 : index
      %c0_12 = arith.constant 0 : index
      %17 = vector.load %arg3[%c0_11, %c0_12] : memref<1x16xf32, #tpu.memory_space<vmem>>, vector<1x16xf32>
      tpu.vector_store %arg3[%c0_11, %c0_12], %16 {strides = array<i32>} : memref<1x16xf32, #tpu.memory_space<vmem>>, vector<1x16xf32>,
    } else {
    }
    %c0 = arith.constant 0 : index
    %c0_1 = arith.constant 0 : index
    %3 = vector.load %arg2[%c0, %c0_1] : memref<16x16xf32, #tpu.memory_space<vmem>>, vector<16x16xf32>
    %cst = arith.constant 9.99999974E-5 : f32
    %4 = vector.broadcast %cst : f32 to vector<16x16xf32>
    %5 = arith.cmpf oge, %3, %4 : vector<16x16xf32>
    %cst_2 = arith.constant 0.000000e+00 : f32
    %6 = vector.broadcast %cst_2 : f32 to vector<16x16xf32>
    %7 = arith.select %5, %3, %6 : vector<16x16xi1>, vector<16x16xf32>
    %c0_3 = arith.constant 0 : index
    %c0_4 = arith.constant 0 : index
    %8 = vector.load %arg3[%c0_3, %c0_4] : memref<1x16xf32, #tpu.memory_space<vmem>>, vector<1x16xf32>
    %cst_5 = arith.constant dense<0.000000e+00> : vector<16xf32>
    %9 = vector.multi_reduction <add>, %7, %cst_5 [0] : vector<16x16xf32> to vector<16xf32>
    %10 = vector.shape_cast %9 : vector<16xf32> to vector<1x16xf32>
    %11 = arith.addf %8, %10 : vector<1x16xf32>
    %c0_6 = arith.constant 0 : index
    %c0_7 = arith.constant 0 : index
    %12 = vector.load %arg3[%c0_6, %c0_7] : memref<1x16xf32, #tpu.memory_space<vmem>>, vector<1x16xf32>
    tpu.vector_store %arg3[%c0_6, %c0_7], %11 {strides = array<i32>} : memref<1x16xf32, #tpu.memory_space<vmem>>, vector<1x16xf32>,
    %c0_i32_8 = arith.constant 0 : i32
    %13 = arith.cmpi eq, %arg1, %c0_i32_8 : i32
    %14 = arith.extui %13 : i1 to i32
    %c0_i32_9 = arith.constant 0 : i32
    %15 = arith.cmpi ne, %14, %c0_i32_9 : i32
    scf.if %15 {
      %c0_10 = arith.constant 0 : index
      %c0_11 = arith.constant 0 : index
      %16 = vector.load %arg3[%c0_10, %c0_11] : memref<1x16xf32, #tpu.memory_space<vmem>>, vector<1x16xf32>
      %cst_12 = arith.constant 1.000000e-10 : f32
      %17 = vector.broadcast %cst_12 : f32 to vector<1x16xf32>
      %18 = arith.addf %16, %17 : vector<1x16xf32>
      %cst_13 = arith.constant 1.000000e+00 : f32
      %19 = vector.broadcast %cst_13 : f32 to vector<1x16xf32>
      %20 = arith.divf %19, %18 : vector<1x16xf32>
      %c0_14 = arith.constant 0 : index
      %c0_15 = arith.constant 0 : index
      %21 = vector.load %arg3[%c0_14, %c0_15] : memref<1x16xf32, #tpu.memory_space<vmem>>, vector<1x16xf32>
      tpu.vector_store %arg3[%c0_14, %c0_15], %20 {strides = array<i32>} : memref<1x16xf32, #tpu.memory_space<vmem>>, vector<1x16xf32>,
    } else {
    }
    return
  }
  func.func @transform_0(%arg0: i32, %arg1: i32) -> (i32, i32) {
    %c0_i32 = arith.constant 0 : i32
    return %arg1, %arg0 : i32, i32
  }
  func.func @transform_1(%arg0: i32, %arg1: i32) -> (i32, i32) {
    %c0_i32 = arith.constant 0 : i32
    %c0_i32_0 = arith.constant 0 : i32
    return %c0_i32, %arg0 : i32, i32
  }
}

module attributes {stable_mosaic.version = 11 : i64} {
  func.func @_diffuse_mlp_kernel(%arg0: i32, %arg1: i32, %arg2: memref<16x16xf32, #tpu.memory_space<vmem>>, %arg3: memref<16x128xf32, #tpu.memory_space<vmem>>, %arg4: memref<128x128xf32, #tpu.memory_space<vmem>>, %arg5: memref<1x128xf32, #tpu.memory_space<vmem>>, %arg6: memref<128x4xf32, #tpu.memory_space<vmem>>, %arg7: memref<1x4xf32, #tpu.memory_space<vmem>>, %arg8: memref<16x4xf32, #tpu.memory_space<vmem>>, %arg9: memref<16x128xf32, #tpu.memory_space<vmem>>) attributes {dimension_semantics = [#tpu.dimension_semantics<parallel>, #tpu.dimension_semantics<arbitrary>], iteration_bounds = array<i64: 1, 1>, scalar_prefetch = 0 : i64, scratch_operands = 1 : i64, tpu.core_type = #tpu.core_type<tc>, window_params = [{transform_indices = @transform_0, window_bounds = array<i64: 16, 16>}, {transform_indices = @transform_1, window_bounds = array<i64: 16, 128>}, {pipeline_mode = #tpu.pipeline_mode<synchronous>, transform_indices = @transform_2, window_bounds = array<i64: 128, 128>}, {pipeline_mode = #tpu.pipeline_mode<synchronous>, transform_indices = @transform_3, window_bounds = array<i64: 1, 128>}, {pipeline_mode = #tpu.pipeline_mode<synchronous>, transform_indices = @transform_4, window_bounds = array<i64: 128, 4>}, {pipeline_mode = #tpu.pipeline_mode<synchronous>, transform_indices = @transform_5, window_bounds = array<i64: 1, 4>}, {transform_indices = @transform_6, window_bounds = array<i64: 16, 4>}]} {
    %c0_i32 = arith.constant 0 : i32
    %0 = arith.cmpi eq, %arg1, %c0_i32 : i32
    %1 = arith.extui %0 : i1 to i32
    %c0_i32_0 = arith.constant 0 : i32
    %2 = arith.cmpi ne, %1, %c0_i32_0 : i32
    scf.if %2 {
      %cst_12 = arith.constant 0.000000e+00 : f32
      %16 = vector.broadcast %cst_12 : f32 to vector<16x128xf32>
      %c0_13 = arith.constant 0 : index
      %c0_14 = arith.constant 0 : index
      %17 = vector.load %arg9[%c0_13, %c0_14] : memref<16x128xf32, #tpu.memory_space<vmem>>, vector<16x128xf32>
      tpu.vector_store %arg9[%c0_13, %c0_14], %16 {strides = array<i32>} : memref<16x128xf32, #tpu.memory_space<vmem>>, vector<16x128xf32>,
    } else {
    }
    %c0 = arith.constant 0 : index
    %c0_1 = arith.constant 0 : index
    %3 = vector.load %arg2[%c0, %c0_1] : memref<16x16xf32, #tpu.memory_space<vmem>>, vector<16x16xf32>
    %cst = arith.constant 9.99999974E-5 : f32
    %4 = vector.broadcast %cst : f32 to vector<16x16xf32>
    %5 = arith.cmpf oge, %3, %4 : vector<16x16xf32>
    %cst_2 = arith.constant 0.000000e+00 : f32
    %6 = vector.broadcast %cst_2 : f32 to vector<16x16xf32>
    %7 = arith.select %5, %3, %6 : vector<16x16xi1>, vector<16x16xf32>
    %c0_3 = arith.constant 0 : index
    %c0_4 = arith.constant 0 : index
    %8 = vector.load %arg3[%c0_3, %c0_4] : memref<16x128xf32, #tpu.memory_space<vmem>>, vector<16x128xf32>
    %c0_5 = arith.constant 0 : index
    %c0_6 = arith.constant 0 : index
    %9 = vector.load %arg9[%c0_5, %c0_6] : memref<16x128xf32, #tpu.memory_space<vmem>>, vector<16x128xf32>
    %cst_7 = arith.constant dense<0.000000e+00> : vector<16x128xf32>
    %10 = tpu.matmul %7, %8, %cst_7 {dimension_numbers = #tpu.dot_dimension_numbers<[1], [0], [0], [1], [0, 0, 1, 1], [], []>} : vector<16x16xf32>, vector<16x128xf32>, vector<16x128xf32> -> vector<16x128xf32>
    %11 = arith.addf %9, %10 : vector<16x128xf32>
    %c0_8 = arith.constant 0 : index
    %c0_9 = arith.constant 0 : index
    %12 = vector.load %arg9[%c0_8, %c0_9] : memref<16x128xf32, #tpu.memory_space<vmem>>, vector<16x128xf32>
    tpu.vector_store %arg9[%c0_8, %c0_9], %11 {strides = array<i32>} : memref<16x128xf32, #tpu.memory_space<vmem>>, vector<16x128xf32>,
    %c0_i32_10 = arith.constant 0 : i32
    %13 = arith.cmpi eq, %arg1, %c0_i32_10 : i32
    %14 = arith.extui %13 : i1 to i32
    %c0_i32_11 = arith.constant 0 : i32
    %15 = arith.cmpi ne, %14, %c0_i32_11 : i32
    scf.if %15 {
      %c0_12 = arith.constant 0 : index
      %c0_13 = arith.constant 0 : index
      %16 = vector.load %arg9[%c0_12, %c0_13] : memref<16x128xf32, #tpu.memory_space<vmem>>, vector<16x128xf32>
      %c0_14 = arith.constant 0 : index
      %c0_15 = arith.constant 0 : index
      %17 = vector.load %arg4[%c0_14, %c0_15] : memref<128x128xf32, #tpu.memory_space<vmem>>, vector<128x128xf32>
      %cst_16 = arith.constant dense<0.000000e+00> : vector<16x128xf32>
      %18 = tpu.matmul %16, %17, %cst_16 {dimension_numbers = #tpu.dot_dimension_numbers<[1], [0], [0], [1], [0, 0, 1, 1], [], []>} : vector<16x128xf32>, vector<128x128xf32>, vector<16x128xf32> -> vector<16x128xf32>
      %c0_17 = arith.constant 0 : index
      %c0_18 = arith.constant 0 : index
      %19 = vector.load %arg5[%c0_17, %c0_18] : memref<1x128xf32, #tpu.memory_space<vmem>>, vector<1x128xf32>
      %20 = vector.broadcast %19 : vector<1x128xf32> to vector<16x128xf32>
      %21 = arith.addf %18, %20 : vector<16x128xf32>
      %cst_19 = arith.constant 0.000000e+00 : f32
      %22 = vector.broadcast %cst_19 : f32 to vector<16x128xf32>
      %23 = arith.maximumf %21, %22 : vector<16x128xf32>
      %c0_20 = arith.constant 0 : index
      %c0_21 = arith.constant 0 : index
      %24 = vector.load %arg6[%c0_20, %c0_21] : memref<128x4xf32, #tpu.memory_space<vmem>>, vector<128x4xf32>
      %cst_22 = arith.constant dense<0.000000e+00> : vector<16x4xf32>
      %25 = tpu.matmul %23, %24, %cst_22 {dimension_numbers = #tpu.dot_dimension_numbers<[1], [0], [0], [1], [0, 0, 1, 1], [], []>} : vector<16x128xf32>, vector<128x4xf32>, vector<16x4xf32> -> vector<16x4xf32>
      %c0_23 = arith.constant 0 : index
      %c0_24 = arith.constant 0 : index
      %26 = vector.load %arg7[%c0_23, %c0_24] : memref<1x4xf32, #tpu.memory_space<vmem>>, vector<1x4xf32>
      %27 = vector.broadcast %26 : vector<1x4xf32> to vector<16x4xf32>
      %28 = arith.addf %25, %27 : vector<16x4xf32>
      %cst_25 = arith.constant dense<0xFF800000> : vector<16xf32>
      %29 = vector.multi_reduction <maximumf>, %28, %cst_25 [1] : vector<16x4xf32> to vector<16xf32>
      %30 = vector.shape_cast %29 : vector<16xf32> to vector<16x1xf32>
      %31 = vector.broadcast %30 : vector<16x1xf32> to vector<16x4xf32>
      %32 = arith.subf %28, %31 : vector<16x4xf32>
      %33 = math.exp %32 : vector<16x4xf32>
      %cst_26 = arith.constant dense<0.000000e+00> : vector<16xf32>
      %34 = vector.multi_reduction <add>, %33, %cst_26 [1] : vector<16x4xf32> to vector<16xf32>
      %35 = vector.shape_cast %34 : vector<16xf32> to vector<16x1xf32>
      %36 = math.log %35 : vector<16x1xf32>
      %37 = vector.broadcast %36 : vector<16x1xf32> to vector<16x4xf32>
      %38 = arith.subf %32, %37 : vector<16x4xf32>
      %c0_27 = arith.constant 0 : index
      %c0_28 = arith.constant 0 : index
      %39 = vector.load %arg8[%c0_27, %c0_28] : memref<16x4xf32, #tpu.memory_space<vmem>>, vector<16x4xf32>
      tpu.vector_store %arg8[%c0_27, %c0_28], %38 {strides = array<i32>} : memref<16x4xf32, #tpu.memory_space<vmem>>, vector<16x4xf32>,
    } else {
    }
    return
  }
  func.func @transform_0(%arg0: i32, %arg1: i32) -> (i32, i32) {
    %c0_i32 = arith.constant 0 : i32
    return %arg0, %arg1 : i32, i32
  }
  func.func @transform_1(%arg0: i32, %arg1: i32) -> (i32, i32) {
    %c0_i32 = arith.constant 0 : i32
    %c0_i32_0 = arith.constant 0 : i32
    return %arg1, %c0_i32 : i32, i32
  }
  func.func @transform_2(%arg0: i32, %arg1: i32) -> (i32, i32) {
    %c0_i32 = arith.constant 0 : i32
    %c0_i32_0 = arith.constant 0 : i32
    %c0_i32_1 = arith.constant 0 : i32
    return %c0_i32, %c0_i32_0 : i32, i32
  }
  func.func @transform_3(%arg0: i32, %arg1: i32) -> (i32, i32) {
    %c0_i32 = arith.constant 0 : i32
    %c0_i32_0 = arith.constant 0 : i32
    %c0_i32_1 = arith.constant 0 : i32
    return %c0_i32, %c0_i32_0 : i32, i32
  }
  func.func @transform_4(%arg0: i32, %arg1: i32) -> (i32, i32) {
    %c0_i32 = arith.constant 0 : i32
    %c0_i32_0 = arith.constant 0 : i32
    %c0_i32_1 = arith.constant 0 : i32
    return %c0_i32, %c0_i32_0 : i32, i32
  }
  func.func @transform_5(%arg0: i32, %arg1: i32) -> (i32, i32) {
    %c0_i32 = arith.constant 0 : i32
    %c0_i32_0 = arith.constant 0 : i32
    %c0_i32_1 = arith.constant 0 : i32
    return %c0_i32, %c0_i32_0 : i32, i32
  }
  func.func @transform_6(%arg0: i32, %arg1: i32) -> (i32, i32) {
    %c0_i32 = arith.constant 0 : i32
    %c0_i32_0 = arith.constant 0 : i32
    return %arg0, %c0_i32 : i32, i32
  }
}

</mosaic_0001>

<bundles_post_ra>
// kernel: custom-call.11
= control target key start
LH: loop header
LB: loop body
LE: loop exit
PB: predicated region body
PF: predicated region fallthrough
CT: control target
= control target key end

     0   :  { %5 = vsyncpa [#allocation4], 0  ;;  %s877_s0 = inlined_call_operand.vmem [shape: f32[16,16], index: 0, kind: input, shape index: {}]   ;;  %s878_s1 = inlined_call_operand.vmem [shape: f32[16,16], index: 1, kind: output, shape index: {0}]   ;;  %s879_s2 = inlined_call_operand.hbm [shape: s32[16], index: 2, kind: output, shape index: {1}]   ;;  %s880_s3 = inlined_call_operand.vmem [shape: s32[16], index: 3, kind: output, shape index: {2}]  }
   0x1   :  { %s19_s14 = scalar_lea.vmem %s877_s0, 8 }
   0x2   :  { %p454_p0 = scmp.gt.s32.totalorder %s877_s0, %s19_s14 }
   0x3   :  { %s747_s17 = smov (!%p454_p0), [#allocation0]   ;;  %s751_s20 = smov (!%p454_p0), %s877_s0  }
   0x4   :  { %455 = sbr.rel (%p454_p0) target bundleno = 21 (0x15), region = 157 }
   0xb LB: > { %v53_v0 = vld [vmem:[%s753_s20] sm:$0xff]  ;;  %s55_s20 = scalar_lea.vmem %s753_s20, 8   ;;  %s753_s20 = sphi %s751_s20, %s55_s20   ;;  %s749_s17 = sphi %s747_s17, %s56_s17  }
   0xc   : > { %54 = vst [vmem:[%s749_s17] sm:$0xff] %v53_v0  ;;  %s56_s17 = scalar_lea.vmem %s749_s17, 8   ;;  %p50_p1 = scmp.gt.s32.totalorder %s55_s20, %s19_s14 }
   0xe   :  { %52 = sbr.rel (!%p50_p1) target bundleno = 11 (0xb), region = 163 }
  0x15 PF:  { %v68_v1 = vld [vmem:[#allocation0] sm:$0xff]  ;;  %v72_v2 = vld [vmem:[#allocation0 + $0x8] sm:$0xff]  ;;  %v75_v3 = vlaneseq  ;;  %v771_v4 = vmov 0   ;;  %s755_s0 = smov 0  }
  0x16   :  { %69 = vst [vmem:[#allocation1] sm:$0xff] %v68_v1  ;;  %73 = vst [vmem:[#allocation1 + $0x8] sm:$0xff] %v72_v2 }
  0x17   :  { %74 = vst [vmem:[#allocation2] sm:$0x1] %v771_v4  ;;  %v803_v5 = vshrl.u32 %v75_v3, 7 }
  0x18 LB: > { %s512_s21 = sshll.u32 %s757_s0, 3  ;;  %s83_s0 = sadd.s32 1, %s757_s0   ;;  %s757_s0 = sphi %s755_s0, %s83_s0  }
  0x19   : > { %v87_v6 = vstv %s512_s21  ;;  %s85_s22 = scalar_lea.vmem [#allocation7], %s512_s21  ;;  %p80_p2 = scmp.ge.s32.totalorder %s83_s0, 2  }
  0x1a   : > { %v88_v7 = vadd.s32 %v87_v6, %v803_v5  ;;  %s806_s23 = smov (%p80_p2), 0  }
  0x1b   :  { %82 = sbr.rel (!%p80_p2) target bundleno = 24 (0x18), region = 174 }
  0x1c   : > { %89 = vst [vmem:[%s85_s22] sm:$0xff] %v88_v7 }
  0x22 LB: > { %v100_v8 = vld [vmem:[#allocation1] sm:$0xff]  ;;  %v112_v9 = vld [vmem:[#allocation1 + $0x8] sm:$0xff]  ;;  %v812_v10 = vadd.s32 8, %v803_v5  ;;  %v815_v12 = vstv %s761_s23  ;;  %s158_s24 = ssub.s32 128, %s761_s23  ;;  %v164_v45 = vand.u32 127, %v75_v3  ;;  %s170_s25 = scalar_lea.vmem [#allocation1], %s761_s23  ;;  %s761_s23 = sphi %s806_s23, %s95_s23  }
  0x23   : > { %v101_v11 = vand.u32 2147483647, %v100_v8  ;;  %v113_v13 = vand.u32 2147483647, %v112_v9  ;;  %vm104_vm0 = vcmp.ge.s32.totalorder %v803_v5, %v815_v12  ;;  %v167_v48 = vld [vmem:[#allocation2] ss:$0 sm:$0xff] }
  0x24   : > { %vm116_vm3 = vcmp.ge.s32.totalorder %v812_v10, %v815_v12  ;;  %vm188_vm13 = vcmp.gt.s32.totalorder %v164_v45, %v815_v12  ;;  %vm211_vm14 = vcmp.gt.s32.totalorder %v812_v10, %v815_v12  ;;  %vm165_vm15 = vcmp.eq.s32.totalorder %v164_v45, %v815_v12  ;;  %v172_v49 = vld [vmem:[%s170_s25] ss:$0 sm:$0xff]  ;;  %s176_s27 = scalar_lea.vmem [#allocation7], %s761_s23  ;;  %s95_s23 = sadd.s32 1, %s761_s23  }
  0x25   : > { %vm514_vm1 = vcmp.gt.f32.partialorder %v101_v11, -inf  ;;  %v178_v50 = vld [vmem:[%s176_s27] ss:$0 sm:$0xff]  ;;  %p92_p3 = scmp.ge.s32.totalorder %s95_s23, 16  }
  0x26   : > { %vm108_vm2 = vmand %vm104_vm0, %vm514_vm1  ;;  %s763_s5 = smov (%p92_p3), %s878_s1   ;;  %s767_s6 = smov (%p92_p3), [#allocation1]  }
  0x27   : > { %v109_v14 = vsel %vm108_vm2, %v803_v5, %v815_v12  ;;  %v110_v15 = vsel %vm108_vm2, %v101_v11, -inf  ;;  %vm835_vm0 = vmand %vm211_vm14, %vm165_vm15  ;;  %vm196_vm2 = vcmp.gt.s32.totalorder %v803_v5, %v815_v12 }
  0x28   : > { %vm119_vm4 = vcmp.lt.f32.partialorder %v110_v15, %v113_v13 }
  0x29   : > { %vm120_vm5 = vmand %vm116_vm3, %vm119_vm4 }
  0x2a   : > { %v121_v16 = vsel %vm120_vm5, %v812_v10, %v109_v14  ;;  %v122_v17 = vsel %vm120_vm5, %v113_v13, %v110_v15  ;;  %vm200_vm4 = vmand %vm196_vm2, %vm165_vm15 }
  0x2b   : > { %v123_v18 = vrot.slane %v122_v17, 1  ;;  %v124_v19 = vrot.slane %v121_v16, 1 }
  0x2d   : > { %vm125_vm6 = vcmp.ge.f32.partialorder %v123_v18, %v122_v17  ;;  %v128_v20 = vrot.slane %v123_v18, 1  ;;  %v129_v21 = vrot.slane %v124_v19, 1 }
  0x2e   : > { %v126_v22 = vsel %vm125_vm6, %v123_v18, %v122_v17  ;;  %v127_v23 = vsel %vm125_vm6, %v124_v19, %v121_v16 }
  0x2f   : > { %vm130_vm7 = vcmp.ge.f32.partialorder %v128_v20, %v126_v22  ;;  %v133_v24 = vrot.slane %v128_v20, 1  ;;  %v134_v25 = vrot.slane %v129_v21, 1 }
  0x30   : > { %v131_v26 = vsel %vm130_vm7, %v128_v20, %v126_v22  ;;  %v132_v27 = vsel %vm130_vm7, %v129_v21, %v127_v23 }
  0x31   : > { %vm135_vm8 = vcmp.ge.f32.partialorder %v133_v24, %v131_v26  ;;  %v138_v28 = vrot.slane %v133_v24, 1  ;;  %v139_v29 = vrot.slane %v134_v25, 1 }
  0x32   : > { %v136_v30 = vsel %vm135_vm8, %v133_v24, %v131_v26  ;;  %v137_v31 = vsel %vm135_vm8, %v134_v25, %v132_v27 }
  0x33   : > { %vm140_vm9 = vcmp.ge.f32.partialorder %v138_v28, %v136_v30  ;;  %v143_v32 = vrot.slane %v138_v28, 1  ;;  %v144_v33 = vrot.slane %v139_v29, 1 }
  0x34   : > { %v141_v34 = vsel %vm140_vm9, %v138_v28, %v136_v30  ;;  %v142_v35 = vsel %vm140_vm9, %v139_v29, %v137_v31 }
  0x35   : > { %vm145_vm10 = vcmp.ge.f32.partialorder %v143_v32, %v141_v34  ;;  %v148_v36 = vrot.slane %v143_v32, 1  ;;  %v149_v37 = vrot.slane %v144_v33, 1 }
  0x36   : > { %v146_v38 = vsel %vm145_vm10, %v143_v32, %v141_v34  ;;  %v147_v39 = vsel %vm145_vm10, %v144_v33, %v142_v35 }
  0x37   : > { %vm150_vm11 = vcmp.ge.f32.partialorder %v148_v36, %v146_v38  ;;  %v153_v40 = vrot.slane %v148_v36, 1  ;;  %v154_v41 = vrot.slane %v149_v37, 1 }
  0x38   : > { %v151_v42 = vsel %vm150_vm11, %v148_v36, %v146_v38  ;;  %v152_v43 = vsel %vm150_vm11, %v149_v37, %v147_v39 }
  0x39   : > { %vm155_vm12 = vcmp.ge.f32.partialorder %v153_v40, %v151_v42 }
  0x3a   : > { %v157_v44 = vsel %vm155_vm12, %v154_v41, %v152_v43 }
  0x3b   : > { %159 = vrot.lane.b32.xlu0 %v157_v44, %s158_s24 }
  0xad   : > { %v160_v47 = vpop.permute.xlu0 %159 }
  0xae   : > { %522 = vpush %v160_v47 }
  0xdf   : > { %s523_s26 = spop %522 }
  0xe0   : > { %v166_v51 = vstv %s523_s26  ;;  %s171_s28 = scalar_lea.vmem [#allocation1], %s523_s26  ;;  %s177_s29 = scalar_lea.vmem [#allocation7], %s523_s26 }
  0xe1   : > { %v168_v52 = vsel %vm165_vm15, %v166_v51, %v167_v48  ;;  %v173_v53 = vld [vmem:[%s171_s28] ss:$0 sm:$0xff] }
  0xe2   : > { %v179_v54 = vld [vmem:[%s177_s29] ss:$0 sm:$0xff]  ;;  %169 = vst [vmem:[#allocation2] sm:$0x1] %v168_v52  ;;  %174 = vst [vmem:[%s171_s28] sm:$0x1] %v172_v49  ;;  %vm182_vm1 = vcmp.ne.f32.partialorder %v173_v53, 0.0 }
  0xe3   : > { %180 = vst [vmem:[%s177_s29] sm:$0x1] %v178_v50  ;;  %175 = vst [vmem:[%s170_s25] sm:$0x1] %v173_v53  ;;  %v189_v2 = vsel %vm188_vm13, %v173_v53, 0.0 }
  0xe4   : > { %181 = vst [vmem:[%s176_s27] sm:$0x1] %v179_v54  ;;  %vm183_vm3 = vmand %vm165_vm15, %vm182_vm1 }
  0xe5   : > { %v184_v55 = vsel %vm183_vm3, %v173_v53, 1.0 }
  0xe6   : > { %v212_v56 = vsel %vm211_vm14, %v184_v55, 1.0  ;;  %v197_v57 = vsel %vm196_vm2, %v184_v55, 1.0 }
  0xe7   : > { %655 = vrcp.f32 %v212_v56 }
  0xe8   : > { %657 = vrcp.f32 %v197_v57 }
  0xe9   :  { %v275_v12 = vld [vmem:[#allocation2] sm:$0x1] (%p92_p3) }
  0xea   : > { %v208_v59 = vld [vmem:[#allocation1 + $0x8] sm:$0xff]  ;;  %v193_v62 = vld [vmem:[#allocation1] sm:$0xff]  ;;  %277 = vst [vmem:[#allocation3] sm:$0x1] (%p92_p3), %v275_v12 }
  0xeb   :  { %v222_v11 = vld [vmem:[#allocation7] sm:$0xff] (%p92_p3)  ;;  %v224_v13 = vld [vmem:[#allocation7 + $0x8] sm:$0xff] (%p92_p3) }
  0xf1   : > { %v656_v58 = vpop.eup %655 }
  0xf2   : > { %v658_v60 = vpop.eup %657  ;;  %v214_v61 = vmul.f32 %v656_v58, %v208_v59 }
  0xf3   : > { %v199_v63 = vmul.f32 %v658_v60, %v193_v62 }
  0xf4   : > { %v216_v0 = vsel %vm835_vm0, %v214_v61, 0.0 }
  0xf5   : > { %217 = vadd.xlane.f32.xlu1 %v216_v0  ;;  %v201_v1 = vsel %vm200_vm4, %v199_v63, 0.0 }
  0xf6   : > { %202 = vadd.xlane.f32.xlu0 %v201_v1 }
 0x123   :  { %239 = vxpose.xlu0.b32.start [1/2] (short) (narrow) (%p92_p3), %v222_v11, 8 }
 0x127   :  { %240 = vxpose.xlu0.b32.end [2/2] (short) (narrow) (%p92_p3), %v224_v13, 8 }
 0x182   : > { %v218_v4 = vpop.xlane.xlu1 %217  ;;  %94 = sbr.rel (!%p92_p3) target bundleno = 34 (0x22), region = 185 }
 0x183   : > { %v219_v6 = vmul.f32 %v218_v4, %v189_v2  ;;  %v203_v7 = vpop.xlane.xlu0 %202 }
 0x184   : > { %v204_v8 = vmul.f32 %v203_v7, %v189_v2 }
 0x185   : > { %v220_v9 = vsub.f32 %v214_v61, %v219_v6 }
 0x186   : > { %v205_v10 = vsub.f32 %v199_v63, %v204_v8 }
 0x187   : > { %221 = vst [vmem:[#allocation1 + $0x8] sm:$0xff] %v220_v9 }
 0x188   : > { %206 = vst [vmem:[#allocation1] sm:$0xff] %v205_v10 }
 0x1a3   :  { %v255_v14 = vpop.trf.xlu0 }
 0x1a4   :  { %271 = vst [vmem:[#allocation5] sm:$0x1] %v255_v14 }
 0x1ab   :  { %v281_v15 = vld [vmem:[#allocation5] sm:$0x1] }
 0x1ac   :  { %283 = vst [vmem:[#allocation6] sm:$0x1] %v281_v15 }
 0x1ad LB: > { %v331_v16 = vld [vmem:[%s769_s6] sm:$0xff]  ;;  %s333_s6 = scalar_lea.vmem %s769_s6, 8   ;;  %s769_s6 = sphi %s767_s6, %s333_s6   ;;  %s765_s5 = sphi %s763_s5, %s334_s5  }
 0x1ae   : > { %332 = vst [vmem:[%s765_s5] sm:$0xff] %v331_v16  ;;  %s334_s5 = scalar_lea.vmem %s765_s5, 8   ;;  %p328_p4 = scmp.gt.s32.totalorder %s333_s6, [#allocation1 + $0x8] }
 0x1af   :  { %s772_s7 = smov (%p328_p4), [#allocation3]  }
 0x1b0   :  { %330 = sbr.rel (!%p328_p4) target bundleno = 429 (0x1ad), region = 207  ;;  %s351_s8 = sshll.u32 (%p328_p4), %s772_s7, 4  ;;  %s352_s8 = int_to_ptr.vmem [resolvable:$true] %s351_s8 }
 0x1b1   :  { %s659_s1 = scalar_lea.vmem (%p328_p4), %s352_s8, 16  ;;  %s663_s11 = scalar_lea.vmem (%p328_p4), %s352_s8, 32 }
 0x1b2   :  { %p660_p5 = scmp.ne.s32.totalorder (%p328_p4), %s352_s8, %s659_s1  ;;  %p664_p6 = scmp.lt.s32.totalorder (%p328_p4), %s352_s8, %s352_s8 }
 0x1b3   :  { %v417_v3 = vld [vmem:[#allocation6] sm:$0x1] (%p328_p4)  ;;  %p665_p7 = scmp.lt.s32.totalorder (%p328_p4), %s663_s11, %s659_s1 }
 0x1b4   :  { %418 = vst [vmem:[%s880_s3] sm:$0x1] (%p328_p4), %v417_v3 }
 0x1b5   :  { %p666_p8 = por (%p328_p4), %p665_p7, %p664_p6 }
 0x1b7   :  { %p667_p9 = pnand %p666_p8, %p660_p5 }
 0x1b9   :  { %670 = shalt.err (!%p667_p9)
}
 0x1ba   :  { %s671_s14 = scalar_lea.hbm %s879_s2, 16 }
 0x1bb   :  { %p672_p10 = scmp.ne.s32.totalorder %s879_s2, %s671_s14  ;;  %p675_p11 = scmp.lt.u32.totalorder %s671_s14, %s879_s2 }
 0x1bd   :  { %p677_p12 = pnand %p675_p11, %p672_p10 }
 0x1bf   :  { %680 = shalt.err (!%p677_p12)
}
 0x1c0   :  { %354 = dma.vmem_to_hbm [thread:$0]  %s352_s8, 16, %s879_s2, [#allocation4]  }
 0x1c1   :  { %745 = dma.done.wait [#allocation4], 16  }
 0x1c2   :  { %746 = vsyncadd [#allocation4], 4294967280 }
 0x1c3   :  { %424 = vsyncpa [#allocation4], 1 }

// kernel: custom-call.12
= control target key start
LH: loop header
LB: loop body
LE: loop exit
PB: predicated region body
PF: predicated region fallthrough
CT: control target
= control target key end

     0   :  { %v38_v0 = vlaneseq  ;;  %v331_v10 = vmov -1.0   ;;  %v332_v47 = vmov 0.0   ;;  %s434_s0 = inlined_call_operand.vmem [shape: f32[1,16,16], index: 0, kind: input, shape index: {}]   ;;  %s435_s1 = inlined_call_operand.vmem [shape: f32[1,16,16], index: 1, kind: output, shape index: {}]  }
   0x1   :  { %v33_v3 = vld [vmem:[%s434_s0 + $0x8] sm:$0xff]  ;;  %v31_v36 = vld [vmem:[%s434_s0] sm:$0xff] }
   0x2   :  { %v343_v1 = vand.u32 127, %v38_v0  ;;  %v345_v2 = vshrl.u32 %v38_v0, 7 }
   0x4   :  { %vm40_vm0 = vcmp.lt.s32.totalorder %v343_v1, 16  ;;  %v59_v4 = vadd.s32 8, %v345_v2  ;;  %vm86_vm4 = vcmp.eq.s32.totalorder %v343_v1, 15  ;;  %vm94_vm6 = vcmp.eq.s32.totalorder %v343_v1, 14 }
   0x5   :  { %v87_v11 = vsel %vm86_vm4, 1.0, %v331_v10  ;;  %vm104_vm7 = vcmp.eq.s32.totalorder %v343_v1, 13  ;;  %vm114_vm8 = vcmp.eq.s32.totalorder %v343_v1, 12  ;;  %vm124_vm9 = vcmp.eq.s32.totalorder %v343_v1, 11 }
   0x6   :  { %vm60_vm1 = vcmp.eq.s32.totalorder %v59_v4, %v343_v1  ;;  %vm65_vm2 = vcmp.le.s32.totalorder %v59_v4, %v343_v1  ;;  %vm83_vm5 = vcmp.eq.s32.totalorder %v343_v1, %v59_v4  ;;  %vm44_vm10 = vcmp.eq.s32.totalorder %v345_v2, %v343_v1 }
   0x7   :  { %v62_v5 = vsel %vm60_vm1, %v33_v3, 0.0  ;;  %vm66_vm3 = vmand %vm65_vm2, %vm40_vm0  ;;  %v88_v12 = vsel %vm83_vm5, %v87_v11, 0.0  ;;  %v46_v37 = vsel %vm44_vm10, %v31_v36, 0.0  ;;  %vm134_vm11 = vcmp.eq.s32.totalorder %v343_v1, 10 }
   0x8   :  { %v67_v6 = vsel %vm66_vm3, %v33_v3, 0.0  ;;  %63 = vadd.xlane.f32.xlu0 %v62_v5  ;;  %vm49_vm12 = vcmp.le.s32.totalorder %v345_v2, %v343_v1  ;;  %vm76_vm14 = vcmp.eq.s32.totalorder %v343_v1, %v345_v2  ;;  %vm144_vm15 = vcmp.eq.s32.totalorder %v343_v1, 9 }
   0x9   :  { %vm50_vm13 = vmand %vm49_vm12, %vm40_vm0  ;;  %v77_v48 = vsel %vm76_vm14, -1.0, %v332_v47  ;;  %vm164_vm0 = vcmp.eq.s32.totalorder %v343_v1, 7  ;;  %vm154_vm1 = vcmp.eq.s32.totalorder %v343_v1, 8  ;;  %vm178_vm2 = vcmp.eq.s32.totalorder %v343_v1, 6 }
   0xa   :  { %v51_v44 = vsel %vm50_vm13, %v31_v36, 0.0  ;;  %vm192_vm3 = vcmp.eq.s32.totalorder %v343_v1, 5  ;;  %vm206_vm4 = vcmp.eq.s32.totalorder %v343_v1, 4  ;;  %vm220_vm5 = vcmp.eq.s32.totalorder %v343_v1, 3 }
  0x95   :  { %v356_v7 = vpop.xlane.xlu0 %63 }
  0x96   :  { %327 = vrcp.f32 %v356_v7  ;;  %vm277_vm10 = vweird.f32 %v356_v7 }
  0xa0   :  { %v359_v8 = vpop.eup %327 }
  0xa1   :  { %v69_v9 = vmul.f32 %v359_v8, %v67_v6 }
  0xa3   :  { %70 = vst [vmem:[#allocation2 + $0x8] sm:$0xff] %v69_v9 }
  0xaa   :  { %v90_v13 = vld [vmem:[#allocation2 + $0xe] ss:$0 sm:$0xff]  ;;  %v100_v16 = vld [vmem:[#allocation2 + $0xd] ss:$0 sm:$0xff]  ;;  %v110_v21 = vld [vmem:[#allocation2 + $0xc] ss:$0 sm:$0xff] }
  0xab   :  { %v91_v14 = vxor.u32 2147483648, %v90_v13  ;;  %v101_v18 = vxor.u32 2147483648, %v100_v16  ;;  %v111_v23 = vxor.u32 2147483648, %v110_v21  ;;  %v120_v26 = vld [vmem:[#allocation2 + $0xb] ss:$0 sm:$0xff] }
  0xac   :  { %v121_v28 = vxor.u32 2147483648, %v120_v26  ;;  %v130_v31 = vld [vmem:[#allocation2 + $0xa] ss:$0 sm:$0xff]  ;;  %v140_v38 = vld [vmem:[#allocation2 + $0x9] ss:$0 sm:$0xff] }
  0xad   :  { %v95_v15 = vmul.f32 %v91_v14, %v88_v12  ;;  %v131_v33 = vxor.u32 2147483648, %v130_v31  ;;  %v141_v40 = vxor.u32 2147483648, %v140_v38  ;;  %v150_v52 = vld [vmem:[#allocation2 + $0x8] ss:$0 sm:$0xff] }
  0xae   :  { %v151_v54 = vxor.u32 2147483648, %v150_v52 }
  0xaf   :  { %96 = vadd.xlane.f32.xlu0 %v95_v15 }
 0x13c   :  { %v97_v17 = vpop.xlane.xlu0 %96 }
 0x13d   :  { %v98_v19 = vsel %vm94_vm6, %v97_v17, %v88_v12  ;;  %vm234_vm6 = vcmp.eq.s32.totalorder %v343_v1, 2 }
 0x13e   :  { %v105_v20 = vmul.f32 %v101_v18, %v98_v19 }
 0x140   :  { %106 = vadd.xlane.f32.xlu1 %v105_v20 }
 0x1cd   :  { %v107_v22 = vpop.xlane.xlu1 %106 }
 0x1ce   :  { %v108_v24 = vsel %vm104_vm7, %v107_v22, %v98_v19  ;;  %vm248_vm7 = vcmp.eq.s32.totalorder %v343_v1, 1 }
 0x1cf   :  { %v115_v25 = vmul.f32 %v111_v23, %v108_v24 }
 0x1d1   :  { %116 = vadd.xlane.f32.xlu1 %v115_v25 }
 0x25e   :  { %v117_v27 = vpop.xlane.xlu1 %116 }
 0x25f   :  { %v118_v29 = vsel %vm114_vm8, %v117_v27, %v108_v24  ;;  %vm261_vm8 = vcmp.eq.s32.totalorder %v343_v1, 0 }
 0x260   :  { %v125_v30 = vmul.f32 %v121_v28, %v118_v29 }
 0x262   :  { %126 = vadd.xlane.f32.xlu0 %v125_v30 }
 0x2ef   :  { %v127_v32 = vpop.xlane.xlu0 %126 }
 0x2f0   :  { %v128_v34 = vsel %vm124_vm9, %v127_v32, %v118_v29 }
 0x2f1   :  { %v135_v35 = vmul.f32 %v131_v33, %v128_v34 }
 0x2f3   :  { %136 = vadd.xlane.f32.xlu1 %v135_v35 }
 0x2f7   :  { %47 = vadd.xlane.f32.xlu1 %v46_v37 }
 0x380   :  { %v137_v39 = vpop.xlane.xlu1 %136 }
 0x381   :  { %v138_v41 = vsel %vm134_vm11, %v137_v39, %v128_v34 }
 0x382   :  { %v145_v42 = vmul.f32 %v141_v40, %v138_v41 }
 0x384   :  { %146 = vadd.xlane.f32.xlu0 %v145_v42  ;;  %v374_v43 = vpop.xlane.xlu1 %47 }
 0x385   :  { %329 = vrcp.f32 %v374_v43  ;;  %vm272_vm9 = vweird.f32 %v374_v43 }
 0x38f   :  { %v381_v45 = vpop.eup %329 }
 0x390   :  { %v53_v46 = vmul.f32 %v381_v45, %v51_v44 }
 0x392   :  { %54 = vst [vmem:[#allocation2] sm:$0xff] %v53_v46 }
 0x399   :  { %v160_v49 = vld [vmem:[#allocation2 + $0x7] ss:$0 sm:$0xff]  ;;  %v174_v57 = vld [vmem:[#allocation2 + $0x6] ss:$0 sm:$0xff]  ;;  %v188_v2 = vld [vmem:[#allocation2 + $0x5] ss:$0 sm:$0xff] }
 0x39a   :  { %v161_v50 = vxor.u32 2147483648, %v160_v49  ;;  %v175_v58 = vxor.u32 2147483648, %v174_v57  ;;  %v189_v4 = vxor.u32 2147483648, %v188_v2  ;;  %v202_v12 = vld [vmem:[#allocation2 + $0x4] ss:$0 sm:$0xff] }
 0x39b   :  { %v203_v14 = vxor.u32 2147483648, %v202_v12  ;;  %v216_v20 = vld [vmem:[#allocation2 + $0x3] ss:$0 sm:$0xff]  ;;  %v230_v28 = vld [vmem:[#allocation2 + $0x2] ss:$0 sm:$0xff] }
 0x39c   :  { %v165_v51 = vmul.f32 %v161_v50, %v77_v48  ;;  %v217_v22 = vxor.u32 2147483648, %v216_v20  ;;  %v231_v30 = vxor.u32 2147483648, %v230_v28  ;;  %v244_v36 = vld [vmem:[#allocation2 + $0x1] ss:$0 sm:$0xff]  ;;  %v257_v46 = vld [vmem:[#allocation2] ss:$0 sm:$0xff] }
 0x39d   :  { %v245_v38 = vxor.u32 2147483648, %v244_v36 }
 0x39e   :  { %166 = vadd.xlane.f32.xlu1 %v165_v51 }
 0x411   :  { %v147_v53 = vpop.xlane.xlu0 %146 }
 0x412   :  { %v148_v55 = vsel %vm144_vm15, %v147_v53, %v138_v41 }
 0x413   :  { %v155_v56 = vmul.f32 %v151_v54, %v148_v55 }
 0x415   :  { %156 = vadd.xlane.f32.xlu0 %v155_v56 }
 0x42b   :  { %v167_v59 = vpop.xlane.xlu1 %166 }
 0x42c   :  { %v168_v60 = vsel %vm164_vm0, %v167_v59, %v77_v48  ;;  %v258_v48 = vxor.u32 2147483648, %v257_v46 }
 0x42d   :  { %v179_v61 = vmul.f32 %v175_v58, %v168_v60 }
 0x42f   :  { %180 = vadd.xlane.f32.xlu1 %v179_v61 }
 0x4a2   :  { %v157_v62 = vpop.xlane.xlu0 %156 }
 0x4a3   :  { %v158_v63 = vsel %vm154_vm1, %v157_v62, %v148_v55 }
 0x4a4   :  { %v169_v0 = vmul.f32 %v161_v50, %v158_v63 }
 0x4a6   :  { %170 = vadd.xlane.f32.xlu0 %v169_v0 }
 0x4bc   :  { %v181_v3 = vpop.xlane.xlu1 %180 }
 0x4bd   :  { %v182_v5 = vsel %vm178_vm2, %v181_v3, %v168_v60 }
 0x4be   :  { %v193_v6 = vmul.f32 %v189_v4, %v182_v5 }
 0x4c0   :  { %194 = vadd.xlane.f32.xlu1 %v193_v6 }
 0x533   :  { %v171_v9 = vpop.xlane.xlu0 %170 }
 0x534   :  { %v172_v10 = vsel %vm164_vm0, %v171_v9, %v158_v63 }
 0x535   :  { %v183_v11 = vmul.f32 %v175_v58, %v172_v10 }
 0x537   :  { %184 = vadd.xlane.f32.xlu0 %v183_v11 }
 0x54d   :  { %v195_v13 = vpop.xlane.xlu1 %194 }
 0x54e   :  { %v196_v15 = vsel %vm192_vm3, %v195_v13, %v182_v5 }
 0x54f   :  { %v207_v16 = vmul.f32 %v203_v14, %v196_v15 }
 0x551   :  { %208 = vadd.xlane.f32.xlu1 %v207_v16 }
 0x5c4   :  { %v185_v17 = vpop.xlane.xlu0 %184 }
 0x5c5   :  { %v186_v18 = vsel %vm178_vm2, %v185_v17, %v172_v10 }
 0x5c6   :  { %v197_v19 = vmul.f32 %v189_v4, %v186_v18 }
 0x5c8   :  { %198 = vadd.xlane.f32.xlu0 %v197_v19 }
 0x5de   :  { %v209_v21 = vpop.xlane.xlu1 %208 }
 0x5df   :  { %v210_v23 = vsel %vm206_vm4, %v209_v21, %v196_v15 }
 0x5e0   :  { %v221_v24 = vmul.f32 %v217_v22, %v210_v23 }
 0x5e2   :  { %222 = vadd.xlane.f32.xlu1 %v221_v24 }
 0x655   :  { %v199_v25 = vpop.xlane.xlu0 %198 }
 0x656   :  { %v200_v26 = vsel %vm192_vm3, %v199_v25, %v186_v18 }
 0x657   :  { %v211_v27 = vmul.f32 %v203_v14, %v200_v26 }
 0x659   :  { %212 = vadd.xlane.f32.xlu0 %v211_v27 }
 0x66f   :  { %v223_v29 = vpop.xlane.xlu1 %222 }
 0x670   :  { %v224_v31 = vsel %vm220_vm5, %v223_v29, %v210_v23 }
 0x671   :  { %v235_v32 = vmul.f32 %v231_v30, %v224_v31 }
 0x673   :  { %236 = vadd.xlane.f32.xlu1 %v235_v32 }
 0x6e6   :  { %v213_v33 = vpop.xlane.xlu0 %212 }
 0x6e7   :  { %v214_v34 = vsel %vm206_vm4, %v213_v33, %v200_v26 }
 0x6e8   :  { %v225_v35 = vmul.f32 %v217_v22, %v214_v34 }
 0x6ea   :  { %226 = vadd.xlane.f32.xlu0 %v225_v35 }
 0x700   :  { %v237_v37 = vpop.xlane.xlu1 %236 }
 0x701   :  { %v238_v39 = vsel %vm234_vm6, %v237_v37, %v224_v31 }
 0x702   :  { %v249_v40 = vmul.f32 %v245_v38, %v238_v39 }
 0x704   :  { %250 = vadd.xlane.f32.xlu1 %v249_v40 }
 0x777   :  { %v227_v41 = vpop.xlane.xlu0 %226 }
 0x778   :  { %v228_v42 = vsel %vm220_vm5, %v227_v41, %v214_v34 }
 0x779   :  { %v239_v44 = vmul.f32 %v231_v30, %v228_v42 }
 0x77b   :  { %240 = vadd.xlane.f32.xlu0 %v239_v44 }
 0x791   :  { %v251_v47 = vpop.xlane.xlu1 %250 }
 0x792   :  { %v252_v49 = vsel %vm248_vm7, %v251_v47, %v238_v39 }
 0x793   :  { %v262_v50 = vmul.f32 %v258_v48, %v252_v49 }
 0x795   :  { %263 = vadd.xlane.f32.xlu1 %v262_v50 }
 0x808   :  { %v241_v51 = vpop.xlane.xlu0 %240 }
 0x809   :  { %v242_v52 = vsel %vm234_vm6, %v241_v51, %v228_v42 }
 0x80a   :  { %v253_v53 = vmul.f32 %v245_v38, %v242_v52 }
 0x80c   :  { %254 = vadd.xlane.f32.xlu0 %v253_v53 }
 0x822   :  { %v264_v54 = vpop.xlane.xlu1 %263 }
 0x823   :  { %v265_v55 = vsel %vm261_vm8, %v264_v54, %v252_v49 }
 0x824   :  { %v271_v56 = vmul.f32 %v381_v45, %v265_v55 }
 0x826   :  { %v273_v57 = vsel %vm272_vm9, %v265_v55, %v271_v56 }
 0x827   :  { %311 = vst [vmem:[%s435_s1] sm:$0xff] %v273_v57 }
 0x899   :  { %v255_v58 = vpop.xlane.xlu0 %254 }
 0x89a   :  { %v256_v59 = vsel %vm248_vm7, %v255_v58, %v242_v52 }
 0x89b   :  { %v266_v60 = vmul.f32 %v258_v48, %v256_v59 }
 0x89d   :  { %267 = vadd.xlane.f32.xlu0 %v266_v60 }
 0x92a   :  { %v268_v61 = vpop.xlane.xlu0 %267 }
 0x92b   :  { %v269_v62 = vsel %vm261_vm8, %v268_v61, %v256_v59 }
 0x92c   :  { %v276_v63 = vmul.f32 %v359_v8, %v269_v62 }
 0x92e   :  { %v278_v45 = vsel %vm277_vm10, %v269_v62, %v276_v63 }
 0x92f   :  { %313 = vst [vmem:[%s435_s1 + $0x8] sm:$0xff] %v278_v45 }

// kernel: custom-call.13
= control target key start
LH: loop header
LB: loop body
LE: loop exit
PB: predicated region body
PF: predicated region fallthrough
CT: control target
= control target key end

     0   :  { %v38_v0 = vlaneseq  ;;  %v332_v9 = vmov -1.0   ;;  %v333_v53 = vmov 0.0   ;;  %s401_s0 = inlined_call_operand.vmem [shape: f32[1,16,16], index: 0, kind: input, shape index: {}]   ;;  %s402_s1 = inlined_call_operand.vmem [shape: f32[1,16,16], index: 1, kind: output, shape index: {}]  }
   0x1   :  { %v31_v1 = vld [vmem:[%s401_s0] sm:$0xff]  ;;  %v33_v36 = vld [vmem:[%s401_s0 + $0x8] sm:$0xff] }
   0x2   :  { %v347_v2 = vand.u32 127, %v38_v0  ;;  %v42_v3 = vshrl.u32 %v38_v0, 7 }
   0x4   :  { %vm44_vm0 = vcmp.eq.s32.totalorder %v42_v3, %v347_v2  ;;  %vm40_vm1 = vcmp.lt.s32.totalorder %v347_v2, 16  ;;  %vm49_vm2 = vcmp.ge.s32.totalorder %v42_v3, %v347_v2  ;;  %vm79_vm4 = vcmp.eq.s32.totalorder %v347_v2, 0 }
   0x5   :  { %v46_v4 = vsel %vm44_vm0, %v31_v1, 0.0  ;;  %vm50_vm3 = vmand %vm49_vm2, %vm40_vm1  ;;  %vm76_vm5 = vcmp.eq.s32.totalorder %v347_v2, %v42_v3  ;;  %v80_v10 = vsel %vm79_vm4, 1.0, %v332_v9  ;;  %vm94_vm6 = vcmp.eq.s32.totalorder %v347_v2, 1 }
   0x6   :  { %47 = vadd.xlane.f32.xlu0 %v46_v4  ;;  %v51_v6 = vsel %vm50_vm3, %v31_v1, 0.0  ;;  %v81_v11 = vsel %vm76_vm5, %v80_v10, 0.0  ;;  %vm104_vm7 = vcmp.eq.s32.totalorder %v347_v2, 2  ;;  %vm114_vm8 = vcmp.eq.s32.totalorder %v347_v2, 3 }
   0x7   :  { %vm124_vm9 = vcmp.eq.s32.totalorder %v347_v2, 4  ;;  %v59_v31 = vadd.s32 8, %v42_v3  ;;  %vm134_vm11 = vcmp.eq.s32.totalorder %v347_v2, 5  ;;  %vm144_vm14 = vcmp.eq.s32.totalorder %v347_v2, 6 }
   0x8   :  { %vm154_vm0 = vcmp.eq.s32.totalorder %v347_v2, 7  ;;  %vm178_vm2 = vcmp.eq.s32.totalorder %v347_v2, 9  ;;  %vm192_vm3 = vcmp.eq.s32.totalorder %v347_v2, 10  ;;  %vm206_vm4 = vcmp.eq.s32.totalorder %v347_v2, 11 }
   0x9   :  { %vm60_vm10 = vcmp.eq.s32.totalorder %v59_v31, %v347_v2  ;;  %vm65_vm12 = vcmp.ge.s32.totalorder %v59_v31, %v347_v2  ;;  %vm87_vm15 = vcmp.eq.s32.totalorder %v347_v2, %v59_v31  ;;  %vm220_vm5 = vcmp.eq.s32.totalorder %v347_v2, 12 }
   0xa   :  { %v62_v37 = vsel %vm60_vm10, %v33_v36, 0.0  ;;  %vm66_vm13 = vmand %vm65_vm12, %vm40_vm1  ;;  %v88_v54 = vsel %vm87_vm15, -1.0, %v333_v53  ;;  %vm164_vm1 = vcmp.eq.s32.totalorder %v347_v2, 8 }
   0xb   :  { %v67_v44 = vsel %vm66_vm13, %v33_v36, 0.0 }
  0x93   :  { %v350_v5 = vpop.xlane.xlu0 %47 }
  0x94   :  { %328 = vrcp.f32 %v350_v5  ;;  %vm273_vm10 = vweird.f32 %v350_v5 }
  0x9e   :  { %v357_v7 = vpop.eup %328 }
  0x9f   :  { %v53_v8 = vmul.f32 %v357_v7, %v51_v6 }
  0xa1   :  { %54 = vst [vmem:[#allocation2] sm:$0xff] %v53_v8 }
  0xa8   :  { %v90_v12 = vld [vmem:[#allocation2 + $0x1] ss:$0 sm:$0xff]  ;;  %v100_v15 = vld [vmem:[#allocation2 + $0x2] ss:$0 sm:$0xff]  ;;  %v110_v20 = vld [vmem:[#allocation2 + $0x3] ss:$0 sm:$0xff] }
  0xa9   :  { %v91_v13 = vxor.u32 2147483648, %v90_v12  ;;  %v101_v17 = vxor.u32 2147483648, %v100_v15  ;;  %v111_v22 = vxor.u32 2147483648, %v110_v20  ;;  %v120_v25 = vld [vmem:[#allocation2 + $0x4] ss:$0 sm:$0xff] }
  0xaa   :  { %v121_v27 = vxor.u32 2147483648, %v120_v25  ;;  %v130_v30 = vld [vmem:[#allocation2 + $0x5] ss:$0 sm:$0xff]  ;;  %v140_v38 = vld [vmem:[#allocation2 + $0x6] ss:$0 sm:$0xff] }
  0xab   :  { %v95_v14 = vmul.f32 %v91_v13, %v81_v11  ;;  %v131_v33 = vxor.u32 2147483648, %v130_v30  ;;  %v141_v40 = vxor.u32 2147483648, %v140_v38  ;;  %v150_v47 = vld [vmem:[#allocation2 + $0x7] ss:$0 sm:$0xff] }
  0xac   :  { %v151_v50 = vxor.u32 2147483648, %v150_v47 }
  0xad   :  { %96 = vadd.xlane.f32.xlu0 %v95_v14 }
 0x13a   :  { %v97_v16 = vpop.xlane.xlu0 %96 }
 0x13b   :  { %v98_v18 = vsel %vm94_vm6, %v97_v16, %v81_v11  ;;  %vm234_vm6 = vcmp.eq.s32.totalorder %v347_v2, 13 }
 0x13c   :  { %v105_v19 = vmul.f32 %v101_v17, %v98_v18 }
 0x13e   :  { %106 = vadd.xlane.f32.xlu1 %v105_v19 }
 0x1cb   :  { %v107_v21 = vpop.xlane.xlu1 %106 }
 0x1cc   :  { %v108_v23 = vsel %vm104_vm7, %v107_v21, %v98_v18  ;;  %vm248_vm7 = vcmp.eq.s32.totalorder %v347_v2, 14 }
 0x1cd   :  { %v115_v24 = vmul.f32 %v111_v22, %v108_v23 }
 0x1cf   :  { %116 = vadd.xlane.f32.xlu1 %v115_v24 }
 0x25c   :  { %v117_v26 = vpop.xlane.xlu1 %116 }
 0x25d   :  { %v118_v28 = vsel %vm114_vm8, %v117_v26, %v108_v23  ;;  %vm262_vm8 = vcmp.eq.s32.totalorder %v347_v2, 15 }
 0x25e   :  { %v125_v29 = vmul.f32 %v121_v27, %v118_v28 }
 0x260   :  { %126 = vadd.xlane.f32.xlu0 %v125_v29 }
 0x2ed   :  { %v127_v32 = vpop.xlane.xlu0 %126 }
 0x2ee   :  { %v128_v34 = vsel %vm124_vm9, %v127_v32, %v118_v28 }
 0x2ef   :  { %v135_v35 = vmul.f32 %v131_v33, %v128_v34 }
 0x2f1   :  { %136 = vadd.xlane.f32.xlu1 %v135_v35 }
 0x2f5   :  { %63 = vadd.xlane.f32.xlu1 %v62_v37 }
 0x37e   :  { %v137_v39 = vpop.xlane.xlu1 %136 }
 0x37f   :  { %v138_v41 = vsel %vm134_vm11, %v137_v39, %v128_v34 }
 0x380   :  { %v145_v42 = vmul.f32 %v141_v40, %v138_v41 }
 0x382   :  { %146 = vadd.xlane.f32.xlu0 %v145_v42  ;;  %v371_v43 = vpop.xlane.xlu1 %63 }
 0x383   :  { %330 = vrcp.f32 %v371_v43  ;;  %vm278_vm9 = vweird.f32 %v371_v43 }
 0x38d   :  { %v377_v45 = vpop.eup %330 }
 0x38e   :  { %v69_v46 = vmul.f32 %v377_v45, %v67_v44 }
 0x390   :  { %70 = vst [vmem:[#allocation2 + $0x8] sm:$0xff] %v69_v46 }
 0x397   :  { %v160_v48 = vld [vmem:[#allocation2 + $0x8] ss:$0 sm:$0xff]  ;;  %v174_v59 = vld [vmem:[#allocation2 + $0x9] ss:$0 sm:$0xff]  ;;  %v188_v4 = vld [vmem:[#allocation2 + $0xa] ss:$0 sm:$0xff] }
 0x398   :  { %v161_v51 = vxor.u32 2147483648, %v160_v48  ;;  %v175_v62 = vxor.u32 2147483648, %v174_v59  ;;  %v189_v9 = vxor.u32 2147483648, %v188_v4  ;;  %v202_v14 = vld [vmem:[#allocation2 + $0xb] ss:$0 sm:$0xff] }
 0x399   :  { %v203_v17 = vxor.u32 2147483648, %v202_v14  ;;  %v216_v22 = vld [vmem:[#allocation2 + $0xc] ss:$0 sm:$0xff]  ;;  %v230_v30 = vld [vmem:[#allocation2 + $0xd] ss:$0 sm:$0xff] }
 0x39a   :  { %v169_v56 = vmul.f32 %v161_v51, %v88_v54  ;;  %v217_v25 = vxor.u32 2147483648, %v216_v22  ;;  %v231_v33 = vxor.u32 2147483648, %v230_v30  ;;  %v244_v38 = vld [vmem:[#allocation2 + $0xe] ss:$0 sm:$0xff]  ;;  %v258_v48 = vld [vmem:[#allocation2 + $0xf] ss:$0 sm:$0xff] }
 0x40f   :  { %v147_v49 = vpop.xlane.xlu0 %146 }
 0x410   :  { %v148_v52 = vsel %vm144_vm14, %v147_v49, %v138_v41  ;;  %v245_v41 = vxor.u32 2147483648, %v244_v38 }
 0x411   :  { %v155_v55 = vmul.f32 %v151_v50, %v148_v52 }
 0x413   :  { %156 = vadd.xlane.f32.xlu0 %v155_v55 }
 0x417   :  { %170 = vadd.xlane.f32.xlu0 %v169_v56 }
 0x4a0   :  { %v157_v57 = vpop.xlane.xlu0 %156 }
 0x4a1   :  { %v158_v58 = vsel %vm154_vm0, %v157_v57, %v148_v52 }
 0x4a2   :  { %v165_v60 = vmul.f32 %v161_v51, %v158_v58  ;;  %v259_v51 = vxor.u32 2147483648, %v258_v48 }
 0x4a4   :  { %v171_v61 = vpop.xlane.xlu0 %170  ;;  %166 = vadd.xlane.f32.xlu1 %v165_v60 }
 0x4a5   :  { %v172_v63 = vsel %vm164_vm1, %v171_v61, %v88_v54 }
 0x4a6   :  { %v183_v0 = vmul.f32 %v175_v62, %v172_v63 }
 0x4a8   :  { %184 = vadd.xlane.f32.xlu0 %v183_v0 }
 0x531   :  { %v167_v1 = vpop.xlane.xlu1 %166 }
 0x532   :  { %v168_v3 = vsel %vm164_vm1, %v167_v1, %v158_v58 }
 0x533   :  { %v179_v6 = vmul.f32 %v175_v62, %v168_v3 }
 0x535   :  { %v185_v8 = vpop.xlane.xlu0 %184  ;;  %180 = vadd.xlane.f32.xlu1 %v179_v6 }
 0x536   :  { %v186_v10 = vsel %vm178_vm2, %v185_v8, %v172_v63 }
 0x537   :  { %v197_v11 = vmul.f32 %v189_v9, %v186_v10 }
 0x539   :  { %198 = vadd.xlane.f32.xlu0 %v197_v11 }
 0x5c2   :  { %v181_v12 = vpop.xlane.xlu1 %180 }
 0x5c3   :  { %v182_v13 = vsel %vm178_vm2, %v181_v12, %v168_v3 }
 0x5c4   :  { %v193_v15 = vmul.f32 %v189_v9, %v182_v13 }
 0x5c6   :  { %v199_v16 = vpop.xlane.xlu0 %198  ;;  %194 = vadd.xlane.f32.xlu1 %v193_v15 }
 0x5c7   :  { %v200_v18 = vsel %vm192_vm3, %v199_v16, %v186_v10 }
 0x5c8   :  { %v211_v19 = vmul.f32 %v203_v17, %v200_v18 }
 0x5ca   :  { %212 = vadd.xlane.f32.xlu0 %v211_v19 }
 0x653   :  { %v195_v20 = vpop.xlane.xlu1 %194 }
 0x654   :  { %v196_v21 = vsel %vm192_vm3, %v195_v20, %v182_v13 }
 0x655   :  { %v207_v23 = vmul.f32 %v203_v17, %v196_v21 }
 0x657   :  { %v213_v24 = vpop.xlane.xlu0 %212  ;;  %208 = vadd.xlane.f32.xlu1 %v207_v23 }
 0x658   :  { %v214_v26 = vsel %vm206_vm4, %v213_v24, %v200_v18 }
 0x659   :  { %v225_v27 = vmul.f32 %v217_v25, %v214_v26 }
 0x65b   :  { %226 = vadd.xlane.f32.xlu0 %v225_v27 }
 0x6e4   :  { %v209_v28 = vpop.xlane.xlu1 %208 }
 0x6e5   :  { %v210_v29 = vsel %vm206_vm4, %v209_v28, %v196_v21 }
 0x6e6   :  { %v221_v31 = vmul.f32 %v217_v25, %v210_v29 }
 0x6e8   :  { %v227_v32 = vpop.xlane.xlu0 %226  ;;  %222 = vadd.xlane.f32.xlu1 %v221_v31 }
 0x6e9   :  { %v228_v34 = vsel %vm220_vm5, %v227_v32, %v214_v26 }
 0x6ea   :  { %v239_v35 = vmul.f32 %v231_v33, %v228_v34 }
 0x6ec   :  { %240 = vadd.xlane.f32.xlu0 %v239_v35 }
 0x775   :  { %v223_v36 = vpop.xlane.xlu1 %222 }
 0x776   :  { %v224_v37 = vsel %vm220_vm5, %v223_v36, %v210_v29 }
 0x777   :  { %v235_v39 = vmul.f32 %v231_v33, %v224_v37 }
 0x779   :  { %v241_v40 = vpop.xlane.xlu0 %240  ;;  %236 = vadd.xlane.f32.xlu1 %v235_v39 }
 0x77a   :  { %v242_v42 = vsel %vm234_vm6, %v241_v40, %v228_v34 }
 0x77b   :  { %v253_v44 = vmul.f32 %v245_v41, %v242_v42 }
 0x77d   :  { %254 = vadd.xlane.f32.xlu0 %v253_v44 }
 0x806   :  { %v237_v46 = vpop.xlane.xlu1 %236 }
 0x807   :  { %v238_v47 = vsel %vm234_vm6, %v237_v46, %v224_v37 }
 0x808   :  { %v249_v49 = vmul.f32 %v245_v41, %v238_v47 }
 0x80a   :  { %v255_v50 = vpop.xlane.xlu0 %254  ;;  %250 = vadd.xlane.f32.xlu1 %v249_v49 }
 0x80b   :  { %v256_v52 = vsel %vm248_vm7, %v255_v50, %v242_v42 }
 0x80c   :  { %v267_v53 = vmul.f32 %v259_v51, %v256_v52 }
 0x80e   :  { %268 = vadd.xlane.f32.xlu0 %v267_v53 }
 0x897   :  { %v251_v54 = vpop.xlane.xlu1 %250 }
 0x898   :  { %v252_v55 = vsel %vm248_vm7, %v251_v54, %v238_v47 }
 0x899   :  { %v263_v56 = vmul.f32 %v259_v51, %v252_v55 }
 0x89b   :  { %v269_v57 = vpop.xlane.xlu0 %268  ;;  %264 = vadd.xlane.f32.xlu1 %v263_v56 }
 0x89c   :  { %v270_v58 = vsel %vm262_vm8, %v269_v57, %v256_v52 }
 0x89d   :  { %v277_v59 = vmul.f32 %v377_v45, %v270_v58 }
 0x89f   :  { %v279_v60 = vsel %vm278_vm9, %v270_v58, %v277_v59 }
 0x8a0   :  { %314 = vst [vmem:[%s402_s1 + $0x8] sm:$0xff] %v279_v60 }
 0x928   :  { %v265_v61 = vpop.xlane.xlu1 %264 }
 0x929   :  { %v266_v62 = vsel %vm262_vm8, %v265_v61, %v252_v55 }
 0x92a   :  { %v272_v63 = vmul.f32 %v357_v7, %v266_v62 }
 0x92c   :  { %v274_v2 = vsel %vm273_vm10, %v266_v62, %v272_v63 }
 0x92d   :  { %312 = vst [vmem:[%s402_s1] sm:$0xff] %v274_v2 }

// kernel: gdc_model_forward.5
= control target key start
LH: loop header
LB: loop body
LE: loop exit
PB: predicated region body
PF: predicated region fallthrough
CT: control target
= control target key end

     0   :  { %v73_v0 = vmov 0   ;;  %v16_v3 = vlaneseq  ;;  %vm63_vm2 = vcmask 130048   ;;  %s119_s1 = inlined_call_operand.vmem [shape: f32[16,1], index: 1, kind: input, shape index: {}]   ;;  %s120_s0 = inlined_call_operand.vmem [shape: f32[16,16], index: 0, kind: input, shape index: {}]   ;;  %s121_s2 = inlined_call_operand.vmem [shape: f32[1,16], index: 2, kind: input, shape index: {}]   ;;  %s122_s3 = inlined_call_operand.vmem [shape: f32[16,16], index: 3, kind: output, shape index: {}]  }
   0x1   :  { %72 = vset.pattern.permute.xlu0 %v73_v0  ;;  %v34_v1 = vld [vmem:[%s119_s1] sm:$0xff]  ;;  %v35_v2 = vld [vmem:[%s119_s1 + $0x8] sm:$0xff] }
   0x2   :  { %38 = vperm.xlu0 %72, %v34_v1   ;;  %v17_v4 = vshrl.u32 %v16_v3, 7  ;;  %v24_v5 = vand.u32 127, %v16_v3  ;;  %v14_v6 = vld [vmem:[%s120_s0] sm:$0xff]  ;;  %v15_v9 = vld [vmem:[%s120_s0 + $0x8] sm:$0xff] }
   0x3   :  { %v30_v7 = vadd.f32 1.0, %v14_v6  ;;  %v31_v11 = vadd.f32 1.0, %v15_v9  ;;  %v70_v12 = vld [vmem:[%s121_s2] ss:$0 sm:$0xff] }
   0x4   :  { %vm28_vm0 = vcmp.eq.s32.totalorder %v17_v4, %v24_v5  ;;  %v18_v8 = vadd.s32 8, %v17_v4 }
   0x5   :  { %v32_v10 = vsel %vm28_vm0, %v30_v7, %v14_v6 }
   0x6   :  { %43 = vperm.xlu0 %72, %v35_v2   ;;  %vm29_vm1 = vcmp.eq.s32.totalorder %v18_v8, %v24_v5 }
   0x7   :  { %v33_v15 = vsel %vm29_vm1, %v31_v11, %v15_v9 }
  0x81   :  { %v39_v13 = vpop.permute.xlu0 %38 }
  0x82   :  { %v46_v14 = vmul.f32 %v39_v13, %v32_v10 }
  0x84   :  { %v55_v16 = vmul.f32 %v70_v12, %v46_v14 }
  0x85   :  { %v44_v17 = vpop.permute.xlu0 %43 }
  0x86   :  { %v57_v18 = vmul.f32 -0.85, %v55_v16  ;;  %v47_v19 = vmul.f32 %v44_v17, %v33_v15 }
  0x88   :  { %v59_v20 = vadd.f32 1.0, %v57_v18  ;;  %v56_v21 = vmul.f32 %v70_v12, %v47_v19 }
  0x8a   :  { %v61_v22 = vsel %vm28_vm0, %v59_v20, %v57_v18  ;;  %v58_v23 = vmul.f32 -0.85, %v56_v21 }
  0x8b   :  { %64 = vst.msk [vmem:[%s122_s3] sm:$0xff] %vm63_vm2, %v61_v22 }
  0x8c   :  { %v60_v24 = vadd.f32 1.0, %v58_v23 }
  0x8e   :  { %v62_v25 = vsel %vm29_vm1, %v60_v24, %v58_v23 }
  0x8f   :  { %65 = vst.msk [vmem:[%s122_s3 + $0x8] sm:$0xff] %vm63_vm2, %v62_v25 }

// kernel: gdc_model_forward.4
= control target key start
LH: loop header
LB: loop body
LE: loop exit
PB: predicated region body
PF: predicated region fallthrough
CT: control target
= control target key end

     0   :  { %vm12_vm0 = vcmask 122880   ;;  %vm17_vm1 = vcmask 130048   ;;  %v45_v0 = vmov 0.0   ;;  %s80_s1 = inlined_call_operand.vmem [shape: f32[1,16], index: 1, kind: output, shape index: {}]   ;;  %s81_s0 = inlined_call_operand.vmem [shape: f32[16,16], index: 0, kind: input, shape index: {}]  }
   0x1   :  { %13 = vst.msk [vmem:[%s80_s1] sm:$0x1] %vm12_vm0, %v45_v0  ;;  %v15_v1 = vld [vmem:[%s81_s0] sm:$0xff]  ;;  %v16_v2 = vld [vmem:[%s81_s0 + $0x8] sm:$0xff] }
   0x2   :  { %v18_v3 = vsel %vm17_vm1, %v15_v1, 0.0  ;;  %v19_v4 = vsel %vm17_vm1, %v16_v2, 0.0 }
   0x3   :  { %v20_v5 = vadd.f32 %v19_v4, %v18_v3 }
   0x5   :  { %v21_v6 = vrot.slane %v20_v5, 4 }
   0x7   :  { %v22_v7 = vadd.f32 %v21_v6, %v20_v5 }
   0x8   :  { %v14_v11 = vld [vmem:[%s80_s1] sm:$0x1] }
   0x9   :  { %v23_v8 = vrot.slane %v22_v7, 2 }
   0xb   :  { %v24_v9 = vadd.f32 %v23_v8, %v22_v7 }
   0xd   :  { %v25_v10 = vrot.slane %v24_v9, 1 }
   0xf   :  { %v26_v12 = vadd.f32 %v25_v10, %v24_v9 }
  0x11   :  { %v27_v13 = vadd.f32 %v26_v12, %v14_v11 }
  0x13   :  { %29 = vst.msk [vmem:[%s80_s1] sm:$0x1] %vm12_vm0, %v27_v13 }
  0x1a   :  { %v33_v14 = vld [vmem:[%s80_s1] sm:$0x1] }
  0x1b   :  { %v34_v15 = vadd.f32 1.0, %v33_v14 }
  0x1d   :  { %v35_v16 = vadd.f32 1e-10, %v34_v15 }
  0x1f   :  { %43 = vrsqrt.f32 %v35_v16 }
  0x29   :  { %v44_v17 = vpop.eup %43 }
  0x2a   :  { %37 = vst.msk [vmem:[%s80_s1] sm:$0x1] %vm12_vm0, %v44_v17 }

// kernel: gdc_model_forward.6
= control target key start
LH: loop header
LB: loop body
LE: loop exit
PB: predicated region body
PF: predicated region fallthrough
CT: control target
= control target key end

     0   :  { %vm12_vm0 = vcmask 122880   ;;  %v49_v0 = vmov 0.0   ;;  %vm21_vm1 = vcmask 130048   ;;  %s84_s1 = inlined_call_operand.vmem [shape: f32[1,16], index: 1, kind: output, shape index: {}]   ;;  %s85_s0 = inlined_call_operand.vmem [shape: f32[16,16], index: 0, kind: input, shape index: {}]  }
   0x1   :  { %13 = vst.msk [vmem:[%s84_s1] sm:$0x1] %vm12_vm0, %v49_v0  ;;  %v14_v1 = vld [vmem:[%s85_s0] sm:$0xff]  ;;  %v15_v2 = vld [vmem:[%s85_s0 + $0x8] sm:$0xff] }
   0x2   :  { %vm16_vm2 = vcmp.ge.f32.partialorder %v14_v1, 0.0001  ;;  %vm17_vm3 = vcmp.ge.f32.partialorder %v15_v2, 0.0001 }
   0x3   :  { %v18_v3 = vsel %vm16_vm2, %v14_v1, 0.0  ;;  %v19_v4 = vsel %vm17_vm3, %v15_v2, 0.0 }
   0x4   :  { %v22_v5 = vsel %vm21_vm1, %v18_v3, 0.0  ;;  %v23_v6 = vsel %vm21_vm1, %v19_v4, 0.0 }
   0x5   :  { %v24_v7 = vadd.f32 %v23_v6, %v22_v5 }
   0x7   :  { %v25_v8 = vrot.slane %v24_v7, 4 }
   0x8   :  { %v20_v13 = vld [vmem:[%s84_s1] sm:$0x1] }
   0x9   :  { %v26_v9 = vadd.f32 %v25_v8, %v24_v7 }
   0xb   :  { %v27_v10 = vrot.slane %v26_v9, 2 }
   0xd   :  { %v28_v11 = vadd.f32 %v27_v10, %v26_v9 }
   0xf   :  { %v29_v12 = vrot.slane %v28_v11, 1 }
  0x11   :  { %v30_v14 = vadd.f32 %v29_v12, %v28_v11 }
  0x13   :  { %v31_v15 = vadd.f32 %v30_v14, %v20_v13 }
  0x15   :  { %33 = vst.msk [vmem:[%s84_s1] sm:$0x1] %vm12_vm0, %v31_v15 }
  0x1c   :  { %v37_v16 = vld [vmem:[%s84_s1] sm:$0x1] }
  0x1d   :  { %v38_v17 = vadd.f32 1e-10, %v37_v16 }
  0x1f   :  { %47 = vrcp.f32 %v38_v17 }
  0x29   :  { %v48_v18 = vpop.eup %47 }
  0x2a   :  { %41 = vst.msk [vmem:[%s84_s1] sm:$0x1] %vm12_vm0, %v48_v18 }

// kernel: gdc_model_forward.7
= control target key start
LH: loop header
LB: loop body
LE: loop exit
PB: predicated region body
PF: predicated region fallthrough
CT: control target
= control target key end

     0   :  { %vm39_vm0 = vcmask 130048   ;;  %vm328_vm3 = vcmask 31744   ;;  %s719_s1 = inlined_call_operand.vmem [shape: f32[16,128], index: 1, kind: input, shape index: {}]   ;;  %s720_s0 = inlined_call_operand.vmem [shape: f32[16,16], index: 0, kind: input, shape index: {}]   ;;  %s721_s2 = inlined_call_operand.vmem [shape: f32[128,128], index: 2, kind: input, shape index: {}]   ;;  %s722_s4 = inlined_call_operand.vmem [shape: f32[128,4], index: 4, kind: input, shape index: {}]   ;;  %s723_s3 = inlined_call_operand.vmem [shape: f32[1,128], index: 3, kind: input, shape index: {}]   ;;  %s724_s5 = inlined_call_operand.vmem [shape: f32[1,4], index: 5, kind: input, shape index: {}]   ;;  %s725_s6 = inlined_call_operand.vmem [shape: f32[16,4], index: 6, kind: output, shape index: {}]  }
   0x1   :  { %v35_v0 = vld [vmem:[%s719_s1] sm:$0xff]  ;;  %v36_v1 = vld [vmem:[%s719_s1 + $0x8] sm:$0xff]  ;;  %v132_v9 = vld [vmem:[%s721_s2 + $0x10] sm:$0xff] }
   0x2   :  { %v29_v2 = vld [vmem:[%s720_s0] sm:$0xff]  ;;  %v480_v3 = vpack.c.bf16 %v36_v1, %v35_v0  ;;  %v30_v4 = vld [vmem:[%s720_s0 + $0x8] sm:$0xff]  ;;  %v133_v10 = vld [vmem:[%s721_s2 + $0x18] sm:$0xff] }
   0x3   :  { %vm31_vm1 = vcmp.ge.f32.partialorder %v29_v2, 0.0001  ;;  %v130_v5 = vld [vmem:[%s721_s2] sm:$0xff]  ;;  %v131_v6 = vld [vmem:[%s721_s2 + $0x8] sm:$0xff]  ;;  %vm32_vm2 = vcmp.ge.f32.partialorder %v30_v4, 0.0001  ;;  %v488_v11 = vpack.c.bf16 %v133_v10, %v132_v9 }
   0x4   :  { %v33_v7 = vsel %vm31_vm1, %v29_v2, 0.0  ;;  %v484_v8 = vpack.c.bf16 %v131_v6, %v130_v5  ;;  %481 = vmatprep.subr.bf16.mxu0 %v480_v3  ;;  %v134_v12 = vld [vmem:[%s721_s2 + $0x20] sm:$0xff]  ;;  %v135_v13 = vld [vmem:[%s721_s2 + $0x28] sm:$0xff]  ;;  %v34_v14 = vsel %vm32_vm2, %v30_v4, 0.0  ;;  %v136_v16 = vld [vmem:[%s721_s2 + $0x30] sm:$0xff] }
   0x5   :  { %407 = vmatprep.mubr.msk.f32.mxu0 %vm39_vm0, %v33_v7  ;;  %483 = vmatpush3.bf16.msra.mxu0 %v480_v3  ;;  %v492_v15 = vpack.c.bf16 %v135_v13, %v134_v12  ;;  %v137_v17 = vld [vmem:[%s721_s2 + $0x38] sm:$0xff]  ;;  %v138_v19 = vld [vmem:[%s721_s2 + $0x40] sm:$0xff]  ;;  %v139_v20 = vld [vmem:[%s721_s2 + $0x48] sm:$0xff] }
   0x6   :  { %485 = vmatprep.subr.bf16.mxu1 %v484_v8  ;;  %v496_v18 = vpack.c.bf16 %v137_v17, %v136_v16  ;;  %v500_v21 = vpack.c.bf16 %v139_v20, %v138_v19  ;;  %v140_v22 = vld [vmem:[%s721_s2 + $0x50] sm:$0xff]  ;;  %v141_v23 = vld [vmem:[%s721_s2 + $0x58] sm:$0xff]  ;;  %v142_v25 = vld [vmem:[%s721_s2 + $0x60] sm:$0xff] }
   0x7   :  { %487 = vmatpush3.bf16.msra.mxu1 %v484_v8  ;;  %v504_v24 = vpack.c.bf16 %v141_v23, %v140_v22  ;;  %v143_v26 = vld [vmem:[%s721_s2 + $0x68] sm:$0xff]  ;;  %v144_v28 = vld [vmem:[%s721_s2 + $0x70] sm:$0xff]  ;;  %v145_v29 = vld [vmem:[%s721_s2 + $0x78] sm:$0xff] }
   0x8   :  { %489 = vmatprep.subr.bf16.mxu1 %v488_v11  ;;  %408 = vmatmul.mubr.msk.f32.vlgmr.msra.gmra.mrb[0].mxu0 %vm39_vm0, %v34_v14  ;;  %v508_v27 = vpack.c.bf16 %v143_v26, %v142_v25  ;;  %v512_v30 = vpack.c.bf16 %v145_v29, %v144_v28  ;;  %v230_v31 = vld [vmem:[%s722_s4] sm:$0xff]  ;;  %v231_v32 = vld [vmem:[%s722_s4 + $0x8] sm:$0xff]  ;;  %v232_v33 = vld [vmem:[%s722_s4 + $0x10] sm:$0xff] }
   0x9   :  { %v516_v34 = vpack.c.bf16 %v231_v32, %v230_v31  ;;  %v233_v35 = vld [vmem:[%s722_s4 + $0x18] sm:$0xff]  ;;  %v234_v37 = vld [vmem:[%s722_s4 + $0x20] sm:$0xff]  ;;  %v235_v38 = vld [vmem:[%s722_s4 + $0x28] sm:$0xff] }
   0xa   :  { %v520_v36 = vpack.c.bf16 %v233_v35, %v232_v33  ;;  %v524_v39 = vpack.c.bf16 %v235_v38, %v234_v37  ;;  %v236_v40 = vld [vmem:[%s722_s4 + $0x30] sm:$0xff]  ;;  %v237_v41 = vld [vmem:[%s722_s4 + $0x38] sm:$0xff]  ;;  %v238_v43 = vld [vmem:[%s722_s4 + $0x40] sm:$0xff] }
   0xb   :  { %491 = vmatpush3.bf16.msra.mxu1 %v488_v11  ;;  %517 = vmatprep.subr.bf16.mxu0 %v516_v34  ;;  %v528_v42 = vpack.c.bf16 %v237_v41, %v236_v40  ;;  %v239_v44 = vld [vmem:[%s722_s4 + $0x48] sm:$0xff]  ;;  %v240_v46 = vld [vmem:[%s722_s4 + $0x50] sm:$0xff]  ;;  %v241_v47 = vld [vmem:[%s722_s4 + $0x58] sm:$0xff] }
   0xc   :  { %493 = vmatprep.subr.bf16.mxu1 %v492_v15  ;;  %519 = vmatpush3.bf16.msra.mxu0 %v516_v34  ;;  %v532_v45 = vpack.c.bf16 %v239_v44, %v238_v43  ;;  %v536_v48 = vpack.c.bf16 %v241_v47, %v240_v46  ;;  %v242_v49 = vld [vmem:[%s722_s4 + $0x60] sm:$0xff]  ;;  %v243_v50 = vld [vmem:[%s722_s4 + $0x68] sm:$0xff]  ;;  %v244_v54 = vld [vmem:[%s722_s4 + $0x70] sm:$0xff] }
   0xd   :  { %521 = vmatprep.subr.bf16.mxu0 %v520_v36  ;;  %v540_v51 = vpack.c.bf16 %v243_v50, %v242_v49  ;;  %v245_v55 = vld [vmem:[%s722_s4 + $0x78] sm:$0xff]  ;;  %v361_v57 = vld [vmem:[%s723_s3] ss:$0 sm:$0xff] }
   0xe   :  { %v544_v56 = vpack.c.bf16 %v245_v55, %v244_v54  ;;  %v362_v0 = vld [vmem:[%s724_s5] ss:$0 sm:$0xff] }
   0xf   :  { %495 = vmatpush3.bf16.msra.mxu1 %v492_v15 }
  0x10   :  { %497 = vmatprep.subr.bf16.mxu1 %v496_v18  ;;  %523 = vmatpush3.bf16.msra.mxu0 %v520_v36 }
  0x11   :  { %525 = vmatprep.subr.bf16.mxu0 %v524_v39 }
  0x13   :  { %499 = vmatpush3.bf16.msra.mxu1 %v496_v18 }
  0x14   :  { %501 = vmatprep.subr.bf16.mxu1 %v500_v21  ;;  %527 = vmatpush3.bf16.msra.mxu0 %v524_v39 }
  0x15   :  { %529 = vmatprep.subr.bf16.mxu0 %v528_v42 }
  0x17   :  { %503 = vmatpush3.bf16.msra.mxu1 %v500_v21 }
  0x18   :  { %505 = vmatprep.subr.bf16.mxu1 %v504_v24  ;;  %531 = vmatpush3.bf16.msra.mxu0 %v528_v42 }
  0x19   :  { %533 = vmatprep.subr.bf16.mxu0 %v532_v45 }
  0x1b   :  { %507 = vmatpush3.bf16.msra.mxu1 %v504_v24 }
  0x1c   :  { %509 = vmatprep.subr.bf16.mxu1 %v508_v27  ;;  %535 = vmatpush3.bf16.msra.mxu0 %v532_v45 }
  0x1d   :  { %537 = vmatprep.subr.bf16.mxu0 %v536_v48 }
  0x1f   :  { %511 = vmatpush3.bf16.msra.mxu1 %v508_v27 }
  0x20   :  { %513 = vmatprep.subr.bf16.mxu1 %v512_v30  ;;  %539 = vmatpush3.bf16.msra.mxu0 %v536_v48 }
  0x21   :  { %541 = vmatprep.subr.bf16.mxu0 %v540_v51 }
  0x23   :  { %515 = vmatpush3.bf16.msra.mxu1 %v512_v30 }
  0x24   :  { %543 = vmatpush3.bf16.msra.mxu0 %v540_v51 }
  0x25   :  { %545 = vmatprep.subr.bf16.mxu0 %v544_v56 }
  0x28   :  { %547 = vmatpush3.bf16.msra.mxu0 %v544_v56 }
  0xdb   :  { %v409_v52 = vpop.f32.mrb[0].mxu0 }
  0xdc   :  { %v112_v53 = vpop.f32.mrb[1].mxu0 }
  0xdd   :  { %442 = vmatprep.mubr.f32.mxu1 %v112_v53 }
  0xde   :  { %443 = vmatmul.mubr.f32.vlgmr.msra.gmra.mrb[0].mxu1 %v409_v52 }
 0x1b1   :  { %v444_v58 = vpop.f32.mrb[0].mxu1 }
 0x1b2   :  { %v225_v59 = vadd.f32 %v444_v58, %v361_v57  ;;  %v219_v60 = vpop.f32.mrb[1].mxu1 }
 0x1b3   :  { %v220_v61 = vadd.f32 %v361_v57, %v219_v60 }
 0x1b4   :  { %v229_v63 = vmax.f32 %v225_v59, 0.0 }
 0x1b5   :  { %v228_v62 = vmax.f32 %v220_v61, 0.0 }
 0x1b7   :  { %477 = vmatprep.mubr.f32.mxu0 %v228_v62 }
 0x1b8   :  { %478 = vmatmul.mubr.f32.vlgmr.msra.gmra.mrb[2].mxu0 %v229_v63 }
 0x28b   :  { %v479_v1 = vpop.f32.mrb[2].mxu0 }
 0x28c   :  { %v319_v2 = vpop.f32.mrb[3].mxu0  ;;  %v325_v4 = vadd.f32 %v479_v1, %v362_v0 }
 0x28d   :  { %v320_v3 = vadd.f32 %v362_v0, %v319_v2 }
 0x28e   :  { %v332_v6 = vsel %vm328_vm3, %v325_v4, -inf }
 0x28f   :  { %v329_v5 = vsel %vm328_vm3, %v320_v3, -inf }
 0x290   :  { %330 = vmax.xlane.f32.xlu0 %v329_v5 }
 0x294   :  { %333 = vmax.xlane.f32.xlu0 %v332_v6 }
 0x31d   :  { %v331_v7 = vpop.xlane.xlu0 %330 }
 0x31e   :  { %v335_v8 = vsub.f32 %v320_v3, %v331_v7 }
 0x320   :  { %v337_v9 = vmul.f32 1.442695, %v335_v8 }
 0x321   :  { %v334_v10 = vpop.xlane.xlu0 %333 }
 0x322   :  { %548 = vpow2.f32 %v337_v9  ;;  %v336_v11 = vsub.f32 %v325_v4, %v334_v10 }
 0x324   :  { %v339_v12 = vmul.f32 1.442695, %v336_v11 }
 0x326   :  { %550 = vpow2.f32 %v339_v12 }
 0x32c   :  { %v549_v13 = vpop.eup %548 }
 0x32d   :  { %v341_v14 = vsel %vm328_vm3, %v549_v13, 0.0 }
 0x32e   :  { %342 = vadd.xlane.f32.xlu1 %v341_v14 }
 0x330   :  { %v551_v15 = vpop.eup %550 }
 0x331   :  { %v344_v16 = vsel %vm328_vm3, %v551_v15, 0.0 }
 0x332   :  { %345 = vadd.xlane.f32.xlu1 %v344_v16 }
 0x3bb   :  { %v343_v17 = vpop.xlane.xlu1 %342 }
 0x3bc   :  { %552 = vlog2.f32 %v343_v17 }
 0x3bf   :  { %v346_v18 = vpop.xlane.xlu1 %345 }
 0x3c0   :  { %554 = vlog2.f32 %v346_v18 }
 0x3c6   :  { %v553_v19 = vpop.eup %552 }
 0x3c7   :  { %v348_v20 = vmul.f32 0.6931472, %v553_v19 }
 0x3c9   :  { %v351_v21 = vsub.f32 %v335_v8, %v348_v20 }
 0x3ca   :  { %v555_v22 = vpop.eup %554 }
 0x3cb   :  { %353 = vst.msk [vmem:[%s725_s6] sm:$0xff] %vm328_vm3, %v351_v21  ;;  %v350_v23 = vmul.f32 0.6931472, %v555_v22 }
 0x3cd   :  { %v352_v24 = vsub.f32 %v336_v11, %v350_v23 }
 0x3cf   :  { %354 = vst.msk [vmem:[%s725_s6 + $0x8] sm:$0xff] %vm328_vm3, %v352_v24 }

</bundles_post_ra>
